<compile_context>
chip_gen: v5e
topology: v5e:2x2
jax: 0.10.0
libtpu: 0.0.40
codegen_flags: <defaults>
</compile_context>

<pallas_src>
import math

import jax
import jax.numpy as jnp
from jax.experimental import pallas as pl
from jax.experimental.pallas import tpu as pltpu


# ---------------------------------------------------------------------------
# Wrapper-side weight preparation (pure JAX, traced once inside jit)
# ---------------------------------------------------------------------------

def psn_gemm_weight(weight, T, order):
    """Banded [T, T] matrix of MaskedSlidingPSN.gen_gemm_weight (vectorized)."""
    i = jnp.arange(T)[:, None]
    j = jnp.arange(T)[None, :]
    d = i - j
    valid = (d >= 0) & (d < order)
    idx = jnp.clip(order - 1 - d, 0, order - 1)
    return jnp.where(valid, weight[idx], 0.0).astype(jnp.float32)


def conv_bn_matrix(w, scale, L):
    """Fold Conv1d(k=3, pad=1, bias=False) + BN scale into one [Cin*L, Cout*L] matrix.

    Activation layout is [rows, Cin*L] (c-major, l-minor), so
      y[r, co*L + l] = sum_{ci,k} w[co,ci,k] * x[r, ci*L + (l+k-1)]   (zero padded)
    which is a right-multiply by sum_k kron(w[:,:,k].T, Shift_k).
    """
    shifts = [jnp.eye(L, k=1, dtype=jnp.float32),    # tap k=0 reads x[l-1]
              jnp.eye(L, dtype=jnp.float32),         # tap k=1 reads x[l]
              jnp.eye(L, k=-1, dtype=jnp.float32)]   # tap k=2 reads x[l+1]
    M = sum(jnp.kron(jnp.transpose(w[:, :, k]), shifts[k]) for k in range(3))
    return M * jnp.repeat(scale, L)[None, :]         # fold BN scale into columns


def pool_matrix(C, L):
    """AvgPool1d(2) as a [C*L, C*(L//2)] right-multiply matrix (per-channel 0.5/0.5)."""
    half = jnp.full((2, 1), 0.5, jnp.float32)
    p_l = jnp.kron(jnp.eye(L // 2, dtype=jnp.float32), half)     # [L, L//2]
    return jnp.kron(jnp.eye(C, dtype=jnp.float32), p_l)          # [C*L, C*L//2]


# ---------------------------------------------------------------------------
# The single fused Pallas kernel (one grid step per block of NB samples)
# ---------------------------------------------------------------------------

def _fused_kernel(x_ref, wtb_ref,
                  m1, b1, m2, b2, m3, b3,
                  m4, b4, m5, b5, m6, b6,
                  w1, bfc, mt_ref, w2_ref, b2_ref,
                  o_ref):
    wtb = wtb_ref[...]                      # bf16 [B, B] block-diag PSN matrix
    a = x_ref[...]                          # bf16 [B, F0] activation slab (B = NB*T)

    def psn_layer(a, m_ref, b_ref):
        # (conv+BN folded) matmul -> block-diag temporal mix -> folded bias -> heaviside.
        y = jnp.dot(a, m_ref[...], preferred_element_type=jnp.float32)
        h = jnp.dot(wtb, y.astype(jnp.bfloat16),
                    preferred_element_type=jnp.float32) + b_ref[...]
        return (h >= 0.0).astype(jnp.bfloat16)       # surrogate.ATan forward, spikes bf16

    # block 1: 3 x (conv + BN + PSN)
    a = psn_layer(a, m1, b1)
    a = psn_layer(a, m2, b2)
    a = psn_layer(a, m3, b3)
    # block 2: 3 x (conv + BN + PSN); AvgPool1d(2) is folded into m4
    a = psn_layer(a, m4, b4)
    a = psn_layer(a, m5, b5)
    a = psn_layer(a, m6, b6)
    # fc head: AvgPool1d(2) + Flatten + fc1 folded into w1, then PSN
    spk = psn_layer(a, w1, bfc)                       # [B, fout1] bf16 spikes

    # mean over T (as a tiny [NB, B] matmul) BEFORE fc2, then lane-padded fc2.
    pooled = jnp.dot(mt_ref[...], spk, preferred_element_type=jnp.float32)   # [NB, fout1]
    o_ref[...] = (jnp.dot(pooled, w2_ref[...], preferred_element_type=jnp.float32)
                  + b2_ref[...])                      # [NB, 128] lane-dense store


# ---------------------------------------------------------------------------
# Full forward pass (matches CIFAR10Net.forward, inference-mode BN)
# ---------------------------------------------------------------------------

def cifar10net_forward(params, x, channels, class_num, P, nb=16, bn_eps=1e-5):
    # x: [N, 3, L, T] -> per-sample layout x0[n, t, ci*L + l] = x[n, ci, l, t]
    N, Cin0, L, T = x.shape
    x0 = jnp.transpose(x, (0, 3, 1, 2)).reshape(N, T, Cin0 * L)

    n_pad = pl.cdiv(N, nb) * nb
    if n_pad != N:
        x0 = jnp.pad(x0, ((0, n_pad - N), (0, 0), (0, 0)))
    # Flatten (n, t) into rows in the wrapper so the kernel needs no reshapes.
    x_flat = x0.reshape(n_pad * T, Cin0 * L).astype(jnp.bfloat16)

    B = nb * T                                                   # rows per grid step

    # PSN temporal-mix matrix, block-diagonal over the NB samples of a step.
    wt = psn_gemm_weight(params['psn_weight'], T, P)             # [T, T]
    wtb = jnp.kron(jnp.eye(nb, dtype=jnp.float32), wt).astype(jnp.bfloat16)
    rs_tiled = jnp.tile(jnp.sum(wt, axis=1), nb)[:, None]        # [B, 1] rowsum per row
    thr = jnp.asarray(params['psn_threshold'], jnp.float32)

    # Conv+BN folded matrices and folded per-layer PSN biases (bias kept f32).
    conv_Ls = [L, L, L, L // 2, L // 2, L // 2]
    mats, biases = [], []
    for p, lc in zip(params['conv'], conv_Ls):
        scale = p['gamma'] / jnp.sqrt(p['rvar'] + bn_eps)
        shift = p['beta'] - p['rmean'] * scale
        mats.append(conv_bn_matrix(p['w'], scale, lc))
        biases.append(rs_tiled * jnp.repeat(shift, lc)[None, :] + thr)   # [B, C*lc]

    # Fold the two AvgPool1d(2) ops into the following linear op (exact).
    p1m = pool_matrix(channels, L)                               # [C*L, C*L/2]
    p2m = pool_matrix(channels, L // 2)                          # [C*L/2, C*L/4]
    mats[3] = p1m @ mats[3]                                      # pool1 -> conv4
    w1 = p2m @ jnp.transpose(params['fc1_w'])                    # pool2+flatten -> fc1
    bfc = rs_tiled * params['fc1_b'][None, :] + thr              # [B, fout1]

    mats = [m.astype(jnp.bfloat16) for m in mats]
    w1 = w1.astype(jnp.bfloat16)

    # mean over T as a [nb, B] matmul; fc2 padded to a lane-dense 128-wide output.
    mt = jnp.kron(jnp.eye(nb, dtype=jnp.float32),
                  jnp.full((1, T), 1.0 / T, jnp.float32)).astype(jnp.bfloat16)
    out_lanes = pl.cdiv(class_num, 128) * 128
    fout1 = params['fc1_b'].shape[0]
    w2 = jnp.zeros((fout1, out_lanes), jnp.float32).at[:, :class_num].set(
        jnp.transpose(params['fc2_w']))
    b2 = jnp.zeros((1, out_lanes), jnp.float32).at[0, :class_num].set(params['fc2_b'])

    weights = [wtb,
               mats[0], biases[0], mats[1], biases[1], mats[2], biases[2],
               mats[3], biases[3], mats[4], biases[4], mats[5], biases[5],
               w1, bfc, mt, w2, b2]

    in_specs = ([pl.BlockSpec((B, Cin0 * L), lambda i: (i, 0))]          # NB-sample slab
                + [pl.BlockSpec(w.shape, lambda i: (0, 0)) for w in weights])

    out = pl.pallas_call(
        _fused_kernel,
        out_shape=jax.ShapeDtypeStruct((n_pad, out_lanes), jnp.float32),
        grid=(n_pad // nb,),
        in_specs=in_specs,
        out_specs=pl.BlockSpec((nb, out_lanes), lambda i: (i, 0)),
        compiler_params=pltpu.CompilerParams(
            dimension_semantics=("parallel",),
            vmem_limit_bytes=32 * 1024 * 1024),
    )(x_flat, *weights)

    return out[:N, :class_num]


# ---------------------------------------------------------------------------
# Parameter init (deterministic, synthetic)
# ---------------------------------------------------------------------------

def init_params(key, channels, class_num, P):
    ks = jax.random.split(key, 16)
    ki = 0
    conv_layers = []
    in_c = 3
    for _blk in range(2):
        for _j in range(3):
            w = jax.random.normal(ks[ki], (channels, in_c, 3), jnp.float32) * 0.1
            ki += 1
            conv_layers.append(dict(
                w=w,
                gamma=1.0 + 0.1 * jnp.arange(channels, dtype=jnp.float32),
                beta=0.01 * jnp.arange(channels, dtype=jnp.float32),
                rmean=0.05 * jnp.arange(channels, dtype=jnp.float32),
                rvar=1.0 + 0.02 * jnp.arange(channels, dtype=jnp.float32),
            ))
            in_c = channels

    # MaskedSlidingPSN, exp_init=True: weight[P-1]=1, halved going backwards.
    psn_weight = 0.5 ** jnp.arange(P - 1, -1, -1, dtype=jnp.float32)
    psn_threshold = jnp.float32(-1.0)

    fin1 = channels * 8
    fout1 = channels * 8 // 4
    fc1_w = jax.random.normal(ks[ki], (fout1, fin1), jnp.float32) / math.sqrt(fin1); ki += 1
    fc1_b = jax.random.normal(ks[ki], (fout1,), jnp.float32) * 0.01; ki += 1
    fc2_w = jax.random.normal(ks[ki], (class_num, fout1), jnp.float32) / math.sqrt(fout1); ki += 1
    fc2_b = jax.random.normal(ks[ki], (class_num,), jnp.float32) * 0.01; ki += 1

    return dict(conv=conv_layers, psn_weight=psn_weight,
                psn_threshold=psn_threshold,
                fc1_w=fc1_w, fc1_b=fc1_b, fc2_w=fc2_w, fc2_b=fc2_b)


# ---------------------------------------------------------------------------
# Main
# ---------------------------------------------------------------------------

if __name__ == "__main__":
    # L must be 32 because the fc layer hardcodes channels * 8 (= channels * L / 4).
    # NB=16 -> NB*T = 128 MXU rows per matmul; N=32 -> grid of 2 (keeps both v7x TCs busy).
    N, L, T = 32, 32, 8
    channels, class_num, P = 4, 10, 4
    NB = 16

    key = jax.random.PRNGKey(0)
    kx, kp = jax.random.split(key)
    x = jax.random.normal(kx, (N, 3, L, T), jnp.float32)
    params = init_params(kp, channels, class_num, P)

    fwd = jax.jit(lambda pp, xx: cifar10net_forward(pp, xx, channels, class_num, P, nb=NB))
    out = jax.block_until_ready(fwd(params, x))
    assert out.shape == (N, class_num), out.shape
    assert jnp.all(jnp.isfinite(out))
    print("KERNEL_OK")
</pallas_src>

<mosaic_0001>
module attributes {stable_mosaic.version = 11 : i64} {
  func.func @_fused_kernel(%arg0: i32, %arg1: memref<128x96xbf16, #tpu.memory_space<vmem>>, %arg2: memref<128x128xbf16, #tpu.memory_space<vmem>>, %arg3: memref<96x128xbf16, #tpu.memory_space<vmem>>, %arg4: memref<128x128xf32, #tpu.memory_space<vmem>>, %arg5: memref<128x128xbf16, #tpu.memory_space<vmem>>, %arg6: memref<128x128xf32, #tpu.memory_space<vmem>>, %arg7: memref<128x128xbf16, #tpu.memory_space<vmem>>, %arg8: memref<128x128xf32, #tpu.memory_space<vmem>>, %arg9: memref<128x64xbf16, #tpu.memory_space<vmem>>, %arg10: memref<128x64xf32, #tpu.memory_space<vmem>>, %arg11: memref<64x64xbf16, #tpu.memory_space<vmem>>, %arg12: memref<128x64xf32, #tpu.memory_space<vmem>>, %arg13: memref<64x64xbf16, #tpu.memory_space<vmem>>, %arg14: memref<128x64xf32, #tpu.memory_space<vmem>>, %arg15: memref<64x8xbf16, #tpu.memory_space<vmem>>, %arg16: memref<128x8xf32, #tpu.memory_space<vmem>>, %arg17: memref<16x128xbf16, #tpu.memory_space<vmem>>, %arg18: memref<8x128xf32, #tpu.memory_space<vmem>>, %arg19: memref<1x128xf32, #tpu.memory_space<vmem>>, %arg20: memref<16x128xf32, #tpu.memory_space<vmem>>) attributes {dimension_semantics = [#tpu.dimension_semantics<parallel>], iteration_bounds = array<i64: 2>, scalar_prefetch = 0 : i64, scratch_operands = 0 : i64, tpu.core_type = #tpu.core_type<tc>, window_params = [{transform_indices = @transform_0, window_bounds = array<i64: 128, 96>}, {pipeline_mode = #tpu.pipeline_mode<synchronous>, transform_indices = @transform_1, window_bounds = array<i64: 128, 128>}, {pipeline_mode = #tpu.pipeline_mode<synchronous>, transform_indices = @transform_2, window_bounds = array<i64: 96, 128>}, {pipeline_mode = #tpu.pipeline_mode<synchronous>, transform_indices = @transform_3, window_bounds = array<i64: 128, 128>}, {pipeline_mode = #tpu.pipeline_mode<synchronous>, transform_indices = @transform_4, window_bounds = array<i64: 128, 128>}, {pipeline_mode = #tpu.pipeline_mode<synchronous>, transform_indices = @transform_5, window_bounds = array<i64: 128, 128>}, {pipeline_mode = #tpu.pipeline_mode<synchronous>, transform_indices = @transform_6, window_bounds = array<i64: 128, 128>}, {pipeline_mode = #tpu.pipeline_mode<synchronous>, transform_indices = @transform_7, window_bounds = array<i64: 128, 128>}, {pipeline_mode = #tpu.pipeline_mode<synchronous>, transform_indices = @transform_8, window_bounds = array<i64: 128, 64>}, {pipeline_mode = #tpu.pipeline_mode<synchronous>, transform_indices = @transform_9, window_bounds = array<i64: 128, 64>}, {pipeline_mode = #tpu.pipeline_mode<synchronous>, transform_indices = @transform_10, window_bounds = array<i64: 64, 64>}, {pipeline_mode = #tpu.pipeline_mode<synchronous>, transform_indices = @transform_11, window_bounds = array<i64: 128, 64>}, {pipeline_mode = #tpu.pipeline_mode<synchronous>, transform_indices = @transform_12, window_bounds = array<i64: 64, 64>}, {pipeline_mode = #tpu.pipeline_mode<synchronous>, transform_indices = @transform_13, window_bounds = array<i64: 128, 64>}, {pipeline_mode = #tpu.pipeline_mode<synchronous>, transform_indices = @transform_14, window_bounds = array<i64: 64, 8>}, {pipeline_mode = #tpu.pipeline_mode<synchronous>, transform_indices = @transform_15, window_bounds = array<i64: 128, 8>}, {pipeline_mode = #tpu.pipeline_mode<synchronous>, transform_indices = @transform_16, window_bounds = array<i64: 16, 128>}, {pipeline_mode = #tpu.pipeline_mode<synchronous>, transform_indices = @transform_17, window_bounds = array<i64: 8, 128>}, {pipeline_mode = #tpu.pipeline_mode<synchronous>, transform_indices = @transform_18, window_bounds = array<i64: 1, 128>}, {transform_indices = @transform_19, window_bounds = array<i64: 16, 128>}]} {
    %c0 = arith.constant 0 : index
    %c0_0 = arith.constant 0 : index
    %0 = vector.load %arg2[%c0, %c0_0] : memref<128x128xbf16, #tpu.memory_space<vmem>>, vector<128x128xbf16>
    %c0_1 = arith.constant 0 : index
    %c0_2 = arith.constant 0 : index
    %1 = vector.load %arg1[%c0_1, %c0_2] : memref<128x96xbf16, #tpu.memory_space<vmem>>, vector<128x96xbf16>
    %c0_3 = arith.constant 0 : index
    %c0_4 = arith.constant 0 : index
    %2 = vector.load %arg3[%c0_3, %c0_4] : memref<96x128xbf16, #tpu.memory_space<vmem>>, vector<96x128xbf16>
    %cst = arith.constant dense<0.000000e+00> : vector<128x128xf32>
    %3 = tpu.matmul %1, %2, %cst {dimension_numbers = #tpu.dot_dimension_numbers<[1], [0], [0], [1], [0, 0, 1, 1], [], []>} : vector<128x96xbf16>, vector<96x128xbf16>, vector<128x128xf32> -> vector<128x128xf32>
    %4 = arith.truncf %3 : vector<128x128xf32> to vector<128x128xbf16>
    %cst_5 = arith.constant dense<0.000000e+00> : vector<128x128xf32>
    %5 = tpu.matmul %0, %4, %cst_5 {dimension_numbers = #tpu.dot_dimension_numbers<[1], [0], [0], [1], [0, 0, 1, 1], [], []>} : vector<128x128xbf16>, vector<128x128xbf16>, vector<128x128xf32> -> vector<128x128xf32>
    %c0_6 = arith.constant 0 : index
    %c0_7 = arith.constant 0 : index
    %6 = vector.load %arg4[%c0_6, %c0_7] : memref<128x128xf32, #tpu.memory_space<vmem>>, vector<128x128xf32>
    %7 = arith.addf %5, %6 : vector<128x128xf32>
    %cst_8 = arith.constant 0.000000e+00 : f32
    %8 = vector.broadcast %cst_8 : f32 to vector<128x128xf32>
    %9 = arith.cmpf oge, %7, %8 : vector<128x128xf32>
    %10 = arith.extui %9 : vector<128x128xi1> to vector<128x128xi32>
    %11 = arith.sitofp %10 : vector<128x128xi32> to vector<128x128xf32>
    %12 = arith.truncf %11 : vector<128x128xf32> to vector<128x128xbf16>
    %c0_9 = arith.constant 0 : index
    %c0_10 = arith.constant 0 : index
    %13 = vector.load %arg5[%c0_9, %c0_10] : memref<128x128xbf16, #tpu.memory_space<vmem>>, vector<128x128xbf16>
    %cst_11 = arith.constant dense<0.000000e+00> : vector<128x128xf32>
    %14 = tpu.matmul %12, %13, %cst_11 {dimension_numbers = #tpu.dot_dimension_numbers<[1], [0], [0], [1], [0, 0, 1, 1], [], []>} : vector<128x128xbf16>, vector<128x128xbf16>, vector<128x128xf32> -> vector<128x128xf32>
    %15 = arith.truncf %14 : vector<128x128xf32> to vector<128x128xbf16>
    %cst_12 = arith.constant dense<0.000000e+00> : vector<128x128xf32>
    %16 = tpu.matmul %0, %15, %cst_12 {dimension_numbers = #tpu.dot_dimension_numbers<[1], [0], [0], [1], [0, 0, 1, 1], [], []>} : vector<128x128xbf16>, vector<128x128xbf16>, vector<128x128xf32> -> vector<128x128xf32>
    %c0_13 = arith.constant 0 : index
    %c0_14 = arith.constant 0 : index
    %17 = vector.load %arg6[%c0_13, %c0_14] : memref<128x128xf32, #tpu.memory_space<vmem>>, vector<128x128xf32>
    %18 = arith.addf %16, %17 : vector<128x128xf32>
    %cst_15 = arith.constant 0.000000e+00 : f32
    %19 = vector.broadcast %cst_15 : f32 to vector<128x128xf32>
    %20 = arith.cmpf oge, %18, %19 : vector<128x128xf32>
    %21 = arith.extui %20 : vector<128x128xi1> to vector<128x128xi32>
    %22 = arith.sitofp %21 : vector<128x128xi32> to vector<128x128xf32>
    %23 = arith.truncf %22 : vector<128x128xf32> to vector<128x128xbf16>
    %c0_16 = arith.constant 0 : index
    %c0_17 = arith.constant 0 : index
    %24 = vector.load %arg7[%c0_16, %c0_17] : memref<128x128xbf16, #tpu.memory_space<vmem>>, vector<128x128xbf16>
    %cst_18 = arith.constant dense<0.000000e+00> : vector<128x128xf32>
    %25 = tpu.matmul %23, %24, %cst_18 {dimension_numbers = #tpu.dot_dimension_numbers<[1], [0], [0], [1], [0, 0, 1, 1], [], []>} : vector<128x128xbf16>, vector<128x128xbf16>, vector<128x128xf32> -> vector<128x128xf32>
    %26 = arith.truncf %25 : vector<128x128xf32> to vector<128x128xbf16>
    %cst_19 = arith.constant dense<0.000000e+00> : vector<128x128xf32>
    %27 = tpu.matmul %0, %26, %cst_19 {dimension_numbers = #tpu.dot_dimension_numbers<[1], [0], [0], [1], [0, 0, 1, 1], [], []>} : vector<128x128xbf16>, vector<128x128xbf16>, vector<128x128xf32> -> vector<128x128xf32>
    %c0_20 = arith.constant 0 : index
    %c0_21 = arith.constant 0 : index
    %28 = vector.load %arg8[%c0_20, %c0_21] : memref<128x128xf32, #tpu.memory_space<vmem>>, vector<128x128xf32>
    %29 = arith.addf %27, %28 : vector<128x128xf32>
    %cst_22 = arith.constant 0.000000e+00 : f32
    %30 = vector.broadcast %cst_22 : f32 to vector<128x128xf32>
    %31 = arith.cmpf oge, %29, %30 : vector<128x128xf32>
    %32 = arith.extui %31 : vector<128x128xi1> to vector<128x128xi32>
    %33 = arith.sitofp %32 : vector<128x128xi32> to vector<128x128xf32>
    %34 = arith.truncf %33 : vector<128x128xf32> to vector<128x128xbf16>
    %c0_23 = arith.constant 0 : index
    %c0_24 = arith.constant 0 : index
    %35 = vector.load %arg9[%c0_23, %c0_24] : memref<128x64xbf16, #tpu.memory_space<vmem>>, vector<128x64xbf16>
    %cst_25 = arith.constant dense<0.000000e+00> : vector<128x64xf32>
    %36 = tpu.matmul %34, %35, %cst_25 {dimension_numbers = #tpu.dot_dimension_numbers<[1], [0], [0], [1], [0, 0, 1, 1], [], []>} : vector<128x128xbf16>, vector<128x64xbf16>, vector<128x64xf32> -> vector<128x64xf32>
    %37 = arith.truncf %36 : vector<128x64xf32> to vector<128x64xbf16>
    %cst_26 = arith.constant dense<0.000000e+00> : vector<128x64xf32>
    %38 = tpu.matmul %0, %37, %cst_26 {dimension_numbers = #tpu.dot_dimension_numbers<[1], [0], [0], [1], [0, 0, 1, 1], [], []>} : vector<128x128xbf16>, vector<128x64xbf16>, vector<128x64xf32> -> vector<128x64xf32>
    %c0_27 = arith.constant 0 : index
    %c0_28 = arith.constant 0 : index
    %39 = vector.load %arg10[%c0_27, %c0_28] : memref<128x64xf32, #tpu.memory_space<vmem>>, vector<128x64xf32>
    %40 = arith.addf %38, %39 : vector<128x64xf32>
    %cst_29 = arith.constant 0.000000e+00 : f32
    %41 = vector.broadcast %cst_29 : f32 to vector<128x64xf32>
    %42 = arith.cmpf oge, %40, %41 : vector<128x64xf32>
    %43 = arith.extui %42 : vector<128x64xi1> to vector<128x64xi32>
    %44 = arith.sitofp %43 : vector<128x64xi32> to vector<128x64xf32>
    %45 = arith.truncf %44 : vector<128x64xf32> to vector<128x64xbf16>
    %c0_30 = arith.constant 0 : index
    %c0_31 = arith.constant 0 : index
    %46 = vector.load %arg11[%c0_30, %c0_31] : memref<64x64xbf16, #tpu.memory_space<vmem>>, vector<64x64xbf16>
    %cst_32 = arith.constant dense<0.000000e+00> : vector<128x64xf32>
    %47 = tpu.matmul %45, %46, %cst_32 {dimension_numbers = #tpu.dot_dimension_numbers<[1], [0], [0], [1], [0, 0, 1, 1], [], []>} : vector<128x64xbf16>, vector<64x64xbf16>, vector<128x64xf32> -> vector<128x64xf32>
    %48 = arith.truncf %47 : vector<128x64xf32> to vector<128x64xbf16>
    %cst_33 = arith.constant dense<0.000000e+00> : vector<128x64xf32>
    %49 = tpu.matmul %0, %48, %cst_33 {dimension_numbers = #tpu.dot_dimension_numbers<[1], [0], [0], [1], [0, 0, 1, 1], [], []>} : vector<128x128xbf16>, vector<128x64xbf16>, vector<128x64xf32> -> vector<128x64xf32>
    %c0_34 = arith.constant 0 : index
    %c0_35 = arith.constant 0 : index
    %50 = vector.load %arg12[%c0_34, %c0_35] : memref<128x64xf32, #tpu.memory_space<vmem>>, vector<128x64xf32>
    %51 = arith.addf %49, %50 : vector<128x64xf32>
    %cst_36 = arith.constant 0.000000e+00 : f32
    %52 = vector.broadcast %cst_36 : f32 to vector<128x64xf32>
    %53 = arith.cmpf oge, %51, %52 : vector<128x64xf32>
    %54 = arith.extui %53 : vector<128x64xi1> to vector<128x64xi32>
    %55 = arith.sitofp %54 : vector<128x64xi32> to vector<128x64xf32>
    %56 = arith.truncf %55 : vector<128x64xf32> to vector<128x64xbf16>
    %c0_37 = arith.constant 0 : index
    %c0_38 = arith.constant 0 : index
    %57 = vector.load %arg13[%c0_37, %c0_38] : memref<64x64xbf16, #tpu.memory_space<vmem>>, vector<64x64xbf16>
    %cst_39 = arith.constant dense<0.000000e+00> : vector<128x64xf32>
    %58 = tpu.matmul %56, %57, %cst_39 {dimension_numbers = #tpu.dot_dimension_numbers<[1], [0], [0], [1], [0, 0, 1, 1], [], []>} : vector<128x64xbf16>, vector<64x64xbf16>, vector<128x64xf32> -> vector<128x64xf32>
    %59 = arith.truncf %58 : vector<128x64xf32> to vector<128x64xbf16>
    %cst_40 = arith.constant dense<0.000000e+00> : vector<128x64xf32>
    %60 = tpu.matmul %0, %59, %cst_40 {dimension_numbers = #tpu.dot_dimension_numbers<[1], [0], [0], [1], [0, 0, 1, 1], [], []>} : vector<128x128xbf16>, vector<128x64xbf16>, vector<128x64xf32> -> vector<128x64xf32>
    %c0_41 = arith.constant 0 : index
    %c0_42 = arith.constant 0 : index
    %61 = vector.load %arg14[%c0_41, %c0_42] : memref<128x64xf32, #tpu.memory_space<vmem>>, vector<128x64xf32>
    %62 = arith.addf %60, %61 : vector<128x64xf32>
    %cst_43 = arith.constant 0.000000e+00 : f32
    %63 = vector.broadcast %cst_43 : f32 to vector<128x64xf32>
    %64 = arith.cmpf oge, %62, %63 : vector<128x64xf32>
    %65 = arith.extui %64 : vector<128x64xi1> to vector<128x64xi32>
    %66 = arith.sitofp %65 : vector<128x64xi32> to vector<128x64xf32>
    %67 = arith.truncf %66 : vector<128x64xf32> to vector<128x64xbf16>
    %c0_44 = arith.constant 0 : index
    %c0_45 = arith.constant 0 : index
    %68 = vector.load %arg15[%c0_44, %c0_45] : memref<64x8xbf16, #tpu.memory_space<vmem>>, vector<64x8xbf16>
    %cst_46 = arith.constant dense<0.000000e+00> : vector<128x8xf32>
    %69 = tpu.matmul %67, %68, %cst_46 {dimension_numbers = #tpu.dot_dimension_numbers<[1], [0], [0], [1], [0, 0, 1, 1], [], []>} : vector<128x64xbf16>, vector<64x8xbf16>, vector<128x8xf32> -> vector<128x8xf32>
    %70 = arith.truncf %69 : vector<128x8xf32> to vector<128x8xbf16>
    %cst_47 = arith.constant dense<0.000000e+00> : vector<128x8xf32>
    %71 = tpu.matmul %0, %70, %cst_47 {dimension_numbers = #tpu.dot_dimension_numbers<[1], [0], [0], [1], [0, 0, 1, 1], [], []>} : vector<128x128xbf16>, vector<128x8xbf16>, vector<128x8xf32> -> vector<128x8xf32>
    %c0_48 = arith.constant 0 : index
    %c0_49 = arith.constant 0 : index
    %72 = vector.load %arg16[%c0_48, %c0_49] : memref<128x8xf32, #tpu.memory_space<vmem>>, vector<128x8xf32>
    %73 = arith.addf %71, %72 : vector<128x8xf32>
    %cst_50 = arith.constant 0.000000e+00 : f32
    %74 = vector.broadcast %cst_50 : f32 to vector<128x8xf32>
    %75 = arith.cmpf oge, %73, %74 : vector<128x8xf32>
    %76 = arith.extui %75 : vector<128x8xi1> to vector<128x8xi32>
    %77 = arith.sitofp %76 : vector<128x8xi32> to vector<128x8xf32>
    %78 = arith.truncf %77 : vector<128x8xf32> to vector<128x8xbf16>
    %c0_51 = arith.constant 0 : index
    %c0_52 = arith.constant 0 : index
    %79 = vector.load %arg17[%c0_51, %c0_52] : memref<16x128xbf16, #tpu.memory_space<vmem>>, vector<16x128xbf16>
    %cst_53 = arith.constant dense<0.000000e+00> : vector<16x8xf32>
    %80 = tpu.matmul %79, %78, %cst_53 {dimension_numbers = #tpu.dot_dimension_numbers<[1], [0], [0], [1], [0, 0, 1, 1], [], []>} : vector<16x128xbf16>, vector<128x8xbf16>, vector<16x8xf32> -> vector<16x8xf32>
    %c0_54 = arith.constant 0 : index
    %c0_55 = arith.constant 0 : index
    %81 = vector.load %arg18[%c0_54, %c0_55] : memref<8x128xf32, #tpu.memory_space<vmem>>, vector<8x128xf32>
    %cst_56 = arith.constant dense<0.000000e+00> : vector<16x128xf32>
    %82 = tpu.matmul %80, %81, %cst_56 {dimension_numbers = #tpu.dot_dimension_numbers<[1], [0], [0], [1], [0, 0, 1, 1], [], []>} : vector<16x8xf32>, vector<8x128xf32>, vector<16x128xf32> -> vector<16x128xf32>
    %c0_57 = arith.constant 0 : index
    %c0_58 = arith.constant 0 : index
    %83 = vector.load %arg19[%c0_57, %c0_58] : memref<1x128xf32, #tpu.memory_space<vmem>>, vector<1x128xf32>
    %84 = vector.broadcast %83 : vector<1x128xf32> to vector<16x128xf32>
    %85 = arith.addf %82, %84 : vector<16x128xf32>
    %c0_59 = arith.constant 0 : index
    %c0_60 = arith.constant 0 : index
    %86 = vector.load %arg20[%c0_59, %c0_60] : memref<16x128xf32, #tpu.memory_space<vmem>>, vector<16x128xf32>
    tpu.vector_store %arg20[%c0_59, %c0_60], %85 {strides = array<i32>} : memref<16x128xf32, #tpu.memory_space<vmem>>, vector<16x128xf32>,
    return
  }
  func.func @transform_0(%arg0: i32) -> (i32, i32) {
    %c0_i32 = arith.constant 0 : i32
    %c0_i32_0 = arith.constant 0 : i32
    return %arg0, %c0_i32 : i32, i32
  }
  func.func @transform_1(%arg0: i32) -> (i32, i32) {
    %c0_i32 = arith.constant 0 : i32
    %c0_i32_0 = arith.constant 0 : i32
    %c0_i32_1 = arith.constant 0 : i32
    return %c0_i32, %c0_i32_0 : i32, i32
  }
  func.func @transform_2(%arg0: i32) -> (i32, i32) {
    %c0_i32 = arith.constant 0 : i32
    %c0_i32_0 = arith.constant 0 : i32
    %c0_i32_1 = arith.constant 0 : i32
    return %c0_i32, %c0_i32_0 : i32, i32
  }
  func.func @transform_3(%arg0: i32) -> (i32, i32) {
    %c0_i32 = arith.constant 0 : i32
    %c0_i32_0 = arith.constant 0 : i32
    %c0_i32_1 = arith.constant 0 : i32
    return %c0_i32, %c0_i32_0 : i32, i32
  }
  func.func @transform_4(%arg0: i32) -> (i32, i32) {
    %c0_i32 = arith.constant 0 : i32
    %c0_i32_0 = arith.constant 0 : i32
    %c0_i32_1 = arith.constant 0 : i32
    return %c0_i32, %c0_i32_0 : i32, i32
  }
  func.func @transform_5(%arg0: i32) -> (i32, i32) {
    %c0_i32 = arith.constant 0 : i32
    %c0_i32_0 = arith.constant 0 : i32
    %c0_i32_1 = arith.constant 0 : i32
    return %c0_i32, %c0_i32_0 : i32, i32
  }
  func.func @transform_6(%arg0: i32) -> (i32, i32) {
    %c0_i32 = arith.constant 0 : i32
    %c0_i32_0 = arith.constant 0 : i32
    %c0_i32_1 = arith.constant 0 : i32
    return %c0_i32, %c0_i32_0 : i32, i32
  }
  func.func @transform_7(%arg0: i32) -> (i32, i32) {
    %c0_i32 = arith.constant 0 : i32
    %c0_i32_0 = arith.constant 0 : i32
    %c0_i32_1 = arith.constant 0 : i32
    return %c0_i32, %c0_i32_0 : i32, i32
  }
  func.func @transform_8(%arg0: i32) -> (i32, i32) {
    %c0_i32 = arith.constant 0 : i32
    %c0_i32_0 = arith.constant 0 : i32
    %c0_i32_1 = arith.constant 0 : i32
    return %c0_i32, %c0_i32_0 : i32, i32
  }
  func.func @transform_9(%arg0: i32) -> (i32, i32) {
    %c0_i32 = arith.constant 0 : i32
    %c0_i32_0 = arith.constant 0 : i32
    %c0_i32_1 = arith.constant 0 : i32
    return %c0_i32, %c0_i32_0 : i32, i32
  }
  func.func @transform_10(%arg0: i32) -> (i32, i32) {
    %c0_i32 = arith.constant 0 : i32
    %c0_i32_0 = arith.constant 0 : i32
    %c0_i32_1 = arith.constant 0 : i32
    return %c0_i32, %c0_i32_0 : i32, i32
  }
  func.func @transform_11(%arg0: i32) -> (i32, i32) {
    %c0_i32 = arith.constant 0 : i32
    %c0_i32_0 = arith.constant 0 : i32
    %c0_i32_1 = arith.constant 0 : i32
    return %c0_i32, %c0_i32_0 : i32, i32
  }
  func.func @transform_12(%arg0: i32) -> (i32, i32) {
    %c0_i32 = arith.constant 0 : i32
    %c0_i32_0 = arith.constant 0 : i32
    %c0_i32_1 = arith.constant 0 : i32
    return %c0_i32, %c0_i32_0 : i32, i32
  }
  func.func @transform_13(%arg0: i32) -> (i32, i32) {
    %c0_i32 = arith.constant 0 : i32
    %c0_i32_0 = arith.constant 0 : i32
    %c0_i32_1 = arith.constant 0 : i32
    return %c0_i32, %c0_i32_0 : i32, i32
  }
  func.func @transform_14(%arg0: i32) -> (i32, i32) {
    %c0_i32 = arith.constant 0 : i32
    %c0_i32_0 = arith.constant 0 : i32
    %c0_i32_1 = arith.constant 0 : i32
    return %c0_i32, %c0_i32_0 : i32, i32
  }
  func.func @transform_15(%arg0: i32) -> (i32, i32) {
    %c0_i32 = arith.constant 0 : i32
    %c0_i32_0 = arith.constant 0 : i32
    %c0_i32_1 = arith.constant 0 : i32
    return %c0_i32, %c0_i32_0 : i32, i32
  }
  func.func @transform_16(%arg0: i32) -> (i32, i32) {
    %c0_i32 = arith.constant 0 : i32
    %c0_i32_0 = arith.constant 0 : i32
    %c0_i32_1 = arith.constant 0 : i32
    return %c0_i32, %c0_i32_0 : i32, i32
  }
  func.func @transform_17(%arg0: i32) -> (i32, i32) {
    %c0_i32 = arith.constant 0 : i32
    %c0_i32_0 = arith.constant 0 : i32
    %c0_i32_1 = arith.constant 0 : i32
    return %c0_i32, %c0_i32_0 : i32, i32
  }
  func.func @transform_18(%arg0: i32) -> (i32, i32) {
    %c0_i32 = arith.constant 0 : i32
    %c0_i32_0 = arith.constant 0 : i32
    %c0_i32_1 = arith.constant 0 : i32
    return %c0_i32, %c0_i32_0 : i32, i32
  }
  func.func @transform_19(%arg0: i32) -> (i32, i32) {
    %c0_i32 = arith.constant 0 : i32
    %c0_i32_0 = arith.constant 0 : i32
    return %arg0, %c0_i32 : i32, i32
  }
}

</mosaic_0001>

<bundles_post_ra>
// kernel: mul.207
= control target key start
LH: loop header
LB: loop body
LE: loop exit
PB: predicated region body
PF: predicated region fallthrough
CT: control target
= control target key end

     0   :  { %s37_s8 = smov 32   ;;  %s38_s9 = smov 64   ;;  %vm7_vm0 = vcmask 261120   ;;  %vm13_vm1 = vcmask 1048320   ;;  %vm19_vm2 = vcmask 785920   ;;  %vm25_vm3 = vcmask 523520   ;;  %s55_s0 = inlined_call_operand.vmem [shape: f32[4,32], index: 0, kind: input, shape index: {}]   ;;  %s56_s1 = inlined_call_operand.vmem [shape: f32[128], index: 1, kind: output, shape index: {}]  }
   0x1   :  { %v4_v0 = vld [vmem:[%s55_s0] sm:$0xf]  ;;  %s36_s0 = smov 96  }
   0x2   :  { %5 = vst [vmem:[#allocation1] sm:$0xf] %v4_v0 }
   0x9   :  { %v10_v1 = vld [vmem:[#allocation1 + $0x3] sm:$0x1]   ;;  %v22_v2 = vld [vmem:[#allocation1 + $0x1] sm:$0x1]   ;;  %v16_v3 = vld [vmem:[#allocation1 + $0x2] sm:$0x1]  }
   0xa   :  { %11 = vrot.lane.b32.xlu0 %v10_v1, %s36_s0  ;;  %23 = vrot.lane.b32.xlu1 %v22_v2, %s37_s8  ;;  %v6_v4 = vld [vmem:[#allocation1] sm:$0x1]  }
   0xb   :  { %8 = vst.msk [vmem:[#allocation0] sm:$0x1] %vm7_vm0, %v6_v4  }
  0x12   :  { %17 = vrot.lane.b32.xlu0 %v16_v3, %s38_s9 }
  0x7c   :  { %v12_v5 = vpop.permute.xlu0 %11   ;;  %v24_v6 = vpop.permute.xlu1 %23  }
  0x7d   :  { %14 = vst.msk [vmem:[#allocation0] sm:$0x1] %vm13_vm1, %v12_v5  }
  0x84   :  { %v18_v7 = vpop.permute.xlu0 %17  }
  0x85   :  { %20 = vst.msk [vmem:[#allocation0] sm:$0x1] %vm19_vm2, %v18_v7  }
  0x86   :  { %26 = vst.msk [vmem:[#allocation0] sm:$0x1] %vm25_vm3, %v24_v6  }
  0x8d   :  { %v29_v8 = vld [vmem:[#allocation0] sm:$0x1] }
  0x8e   :  { %32 = vst [vmem:[%s56_s1] sm:$0x1] %v29_v8 }

// kernel: tile.8
= control target key start
LH: loop header
LB: loop body
LE: loop exit
PB: predicated region body
PF: predicated region fallthrough
CT: control target
= control target key end

     0   :  { %s28_s0 = inlined_call_operand.vmem [shape: f32[8], index: 0, kind: input, shape index: {}]   ;;  %s29_s1 = inlined_call_operand.vmem [shape: f32[16,8], index: 1, kind: output, shape index: {}]  }
   0x1   :  { %v4_v0 = vld [vmem:[%s28_s0] ss:$0 sm:$0xff] }
   0x2   :  { %5 = vst [vmem:[%s29_s1] sm:$0xff] %v4_v0 }
   0x3   :  { %8 = vst [vmem:[%s29_s1 + $0x8] sm:$0xff] %v4_v0 }

// kernel: mul.211
= control target key start
LH: loop header
LB: loop body
LE: loop exit
PB: predicated region body
PF: predicated region fallthrough
CT: control target
= control target key end

     0   :  { %s131_s10 = smov 120   ;;  %s132_s11 = smov 104   ;;  %vm3_vm0 = vcmask 64512   ;;  %vm9_vm1 = vcmask 1048512   ;;  %vm15_vm2 = vcmask 982912   ;;  %vm21_vm3 = vcmask 917312   ;;  %s207_s0 = inlined_call_operand.vmem [shape: f32[16,8], index: 0, kind: input, shape index: {}]   ;;  %s208_s1 = inlined_call_operand.vmem [shape: f32[128], index: 1, kind: output, shape index: {}]  }
   0x1   :  { %v101_v0 = vld [vmem:[%s207_s0 + $0xf] sm:$0x1]   ;;  %v103_v1 = vld [vmem:[%s207_s0 + $0xd] sm:$0x1]   ;;  %v105_v2 = vld [vmem:[%s207_s0 + $0xb] sm:$0x1]  }
   0x2   :  { %7 = vrot.lane.b32.xlu0 %v101_v0, %s131_s10  ;;  %19 = vrot.lane.b32.xlu1 %v103_v1, %s132_s11  ;;  %s133_s14 = smov 88   ;;  %v102_v3 = vld [vmem:[%s207_s0 + $0xe] sm:$0x1]   ;;  %v104_v4 = vld [vmem:[%s207_s0 + $0xc] sm:$0x1]   ;;  %s134_s19 = smov 112  }
   0x3   :  { %31 = vrot.lane.b32.xlu2 %v105_v2, %s133_s14  ;;  %s135_s20 = smov 96   ;;  %v106_v5 = vld [vmem:[%s207_s0 + $0xa] sm:$0x1]   ;;  %s136_s23 = smov 80   ;;  %v107_v6 = vld [vmem:[%s207_s0 + $0x9] sm:$0x1]  }
   0x4   :  { %v108_v7 = vld [vmem:[%s207_s0 + $0x8] sm:$0x1]   ;;  %s137_s28 = smov 72   ;;  %s138_s29 = smov 64   ;;  %v109_v8 = vld [vmem:[%s207_s0 + $0x7] sm:$0x1]  }
   0x5   :  { %s139_s3 = smov 56   ;;  %v110_v9 = vld [vmem:[%s207_s0 + $0x6] sm:$0x1]   ;;  %v111_v10 = vld [vmem:[%s207_s0 + $0x5] sm:$0x1]   ;;  %s140_s8 = smov 48  }
   0x6   :  { %s141_s9 = smov 40   ;;  %v112_v11 = vld [vmem:[%s207_s0 + $0x4] sm:$0x1]   ;;  %s142_s12 = smov 32   ;;  %v113_v12 = vld [vmem:[%s207_s0 + $0x3] sm:$0x1]  }
   0x7   :  { %v114_v13 = vld [vmem:[%s207_s0 + $0x2] sm:$0x1]   ;;  %s143_s17 = smov 24   ;;  %s144_s18 = smov 16   ;;  %v115_v14 = vld [vmem:[%s207_s0 + $0x1] sm:$0x1]  }
   0x8   :  { %s145_s21 = smov 8   ;;  %v2_v15 = vld [vmem:[%s207_s0] sm:$0x1]   ;;  %vm27_vm4 = vcmask 851712   ;;  %vm33_vm5 = vcmask 786112   ;;  %vm39_vm6 = vcmask 720512  }
   0x9   :  { %4 = vst.msk [vmem:[#allocation0] sm:$0x1] %vm3_vm0, %v2_v15   ;;  %vm45_vm7 = vcmask 654912   ;;  %vm51_vm8 = vcmask 589312   ;;  %vm57_vm9 = vcmask 523712   ;;  %vm63_vm10 = vcmask 458112  }
   0xa   :  { %13 = vrot.lane.b32.xlu0 %v102_v3, %s134_s19  ;;  %25 = vrot.lane.b32.xlu1 %v104_v4, %s135_s20  ;;  %vm69_vm11 = vcmask 392512   ;;  %vm75_vm12 = vcmask 326912   ;;  %vm81_vm13 = vcmask 261312   ;;  %vm87_vm14 = vcmask 195712  }
   0xb   :  { %37 = vrot.lane.b32.xlu2 %v106_v5, %s136_s23  ;;  %vm93_vm15 = vcmask 130112  }
  0x12   :  { %43 = vrot.lane.b32.xlu0 %v107_v6, %s137_s28  ;;  %49 = vrot.lane.b32.xlu1 %v108_v7, %s138_s29 }
  0x13   :  { %55 = vrot.lane.b32.xlu2 %v109_v8, %s139_s3 }
  0x1a   :  { %61 = vrot.lane.b32.xlu0 %v110_v9, %s140_s8  ;;  %67 = vrot.lane.b32.xlu1 %v111_v10, %s141_s9 }
  0x1b   :  { %73 = vrot.lane.b32.xlu2 %v112_v11, %s142_s12 }
  0x22   :  { %79 = vrot.lane.b32.xlu0 %v113_v12, %s143_s17  ;;  %85 = vrot.lane.b32.xlu1 %v114_v13, %s144_s18 }
  0x23   :  { %91 = vrot.lane.b32.xlu2 %v115_v14, %s145_s21 }
  0x5d   :  { %v32_v16 = vpop.permute.xlu2 %31  }
  0x65   :  { %v38_v17 = vpop.permute.xlu2 %37  }
  0x6d   :  { %v56_v18 = vpop.permute.xlu2 %55  }
  0x74   :  { %v8_v19 = vpop.permute.xlu0 %7   ;;  %v20_v20 = vpop.permute.xlu1 %19  }
  0x75   :  { %10 = vst.msk [vmem:[#allocation0] sm:$0x1] %vm9_vm1, %v8_v19   ;;  %v74_v21 = vpop.permute.xlu2 %73  }
  0x7c   :  { %v14_v22 = vpop.permute.xlu0 %13   ;;  %v26_v23 = vpop.permute.xlu1 %25  }
  0x7d   :  { %16 = vst.msk [vmem:[#allocation0] sm:$0x1] %vm15_vm2, %v14_v22   ;;  %v92_v24 = vpop.permute.xlu2 %91  }
  0x7e   :  { %22 = vst.msk [vmem:[#allocation0] sm:$0x1] %vm21_vm3, %v20_v20  }
  0x7f   :  { %28 = vst.msk [vmem:[#allocation0] sm:$0x1] %vm27_vm4, %v26_v23  }
  0x80   :  { %34 = vst.msk [vmem:[#allocation0] sm:$0x1] %vm33_vm5, %v32_v16  }
  0x81   :  { %40 = vst.msk [vmem:[#allocation0] sm:$0x1] %vm39_vm6, %v38_v17  }
  0x84   :  { %v44_v25 = vpop.permute.xlu0 %43   ;;  %v50_v26 = vpop.permute.xlu1 %49  }
  0x85   :  { %46 = vst.msk [vmem:[#allocation0] sm:$0x1] %vm45_vm7, %v44_v25  }
  0x86   :  { %52 = vst.msk [vmem:[#allocation0] sm:$0x1] %vm51_vm8, %v50_v26  }
  0x87   :  { %58 = vst.msk [vmem:[#allocation0] sm:$0x1] %vm57_vm9, %v56_v18  }
  0x8c   :  { %v62_v27 = vpop.permute.xlu0 %61   ;;  %v68_v28 = vpop.permute.xlu1 %67  }
  0x8d   :  { %64 = vst.msk [vmem:[#allocation0] sm:$0x1] %vm63_vm10, %v62_v27  }
  0x8e   :  { %70 = vst.msk [vmem:[#allocation0] sm:$0x1] %vm69_vm11, %v68_v28  }
  0x8f   :  { %76 = vst.msk [vmem:[#allocation0] sm:$0x1] %vm75_vm12, %v74_v21  }
  0x94   :  { %v80_v29 = vpop.permute.xlu0 %79   ;;  %v86_v30 = vpop.permute.xlu1 %85  }
  0x95   :  { %82 = vst.msk [vmem:[#allocation0] sm:$0x1] %vm81_vm13, %v80_v29  }
  0x96   :  { %88 = vst.msk [vmem:[#allocation0] sm:$0x1] %vm87_vm14, %v86_v30  }
  0x97   :  { %94 = vst.msk [vmem:[#allocation0] sm:$0x1] %vm93_vm15, %v92_v24  }
  0x9e   :  { %v97_v31 = vld [vmem:[#allocation0] sm:$0x1] }
  0x9f   :  { %100 = vst [vmem:[%s208_s1] sm:$0x1] %v97_v31 }

// kernel: mul.274
= control target key start
LH: loop header
LB: loop body
LE: loop exit
PB: predicated region body
PF: predicated region fallthrough
CT: control target
= control target key end

     0   :  { %s37_s8 = smov 16   ;;  %s38_s9 = smov 32   ;;  %vm7_vm0 = vcmask 130048   ;;  %vm13_vm1 = vcmask 523648   ;;  %vm19_vm2 = vcmask 392448   ;;  %vm25_vm3 = vcmask 261248   ;;  %s55_s0 = inlined_call_operand.vmem [shape: f32[4,16], index: 0, kind: input, shape index: {}]   ;;  %s56_s1 = inlined_call_operand.vmem [shape: f32[64], index: 1, kind: output, shape index: {}]  }
   0x1   :  { %v4_v0 = vld [vmem:[%s55_s0] sm:$0xf]  ;;  %s36_s0 = smov 48  }
   0x2   :  { %5 = vst [vmem:[#allocation1] sm:$0xf] %v4_v0 }
   0x9   :  { %v10_v1 = vld [vmem:[#allocation1 + $0x3] sm:$0x1]   ;;  %v22_v2 = vld [vmem:[#allocation1 + $0x1] sm:$0x1]   ;;  %v16_v3 = vld [vmem:[#allocation1 + $0x2] sm:$0x1]  }
   0xa   :  { %11 = vrot.lane.b32.xlu0 %v10_v1, %s36_s0  ;;  %23 = vrot.lane.b32.xlu1 %v22_v2, %s37_s8  ;;  %v6_v4 = vld [vmem:[#allocation1] sm:$0x1]  }
   0xb   :  { %8 = vst.msk [vmem:[#allocation0] sm:$0x1] %vm7_vm0, %v6_v4  }
  0x12   :  { %17 = vrot.lane.b32.xlu0 %v16_v3, %s38_s9 }
  0x7c   :  { %v12_v5 = vpop.permute.xlu0 %11   ;;  %v24_v6 = vpop.permute.xlu1 %23  }
  0x7d   :  { %14 = vst.msk [vmem:[#allocation0] sm:$0x1] %vm13_vm1, %v12_v5  }
  0x84   :  { %v18_v7 = vpop.permute.xlu0 %17  }
  0x85   :  { %20 = vst.msk [vmem:[#allocation0] sm:$0x1] %vm19_vm2, %v18_v7  }
  0x86   :  { %26 = vst.msk [vmem:[#allocation0] sm:$0x1] %vm25_vm3, %v24_v6  }
  0x8d   :  { %v29_v8 = vld [vmem:[#allocation0] sm:$0x1] }
  0x8e   :  { %32 = vst [vmem:[%s56_s1] sm:$0x1] %v29_v8 }

// kernel: _lambda_.1
= control target key start
LH: loop header
LB: loop body
LE: loop exit
PB: predicated region body
PF: predicated region fallthrough
CT: control target
= control target key end

     0   :  { %s3937_s0 = inlined_call_operand.vmem [shape: bf16[256,96], index: 0, kind: input, shape index: {}]   ;;  %s3938_s1 = inlined_call_operand.vmem [shape: bf16[128,128], index: 1, kind: input, shape index: {}]   ;;  %s3939_s2 = inlined_call_operand.vmem [shape: bf16[96,128], index: 2, kind: input, shape index: {}]   ;;  %s3940_s3 = inlined_call_operand.vmem [shape: f32[128,128], index: 3, kind: input, shape index: {}]   ;;  %s3941_s4 = inlined_call_operand.vmem [shape: bf16[128,128], index: 4, kind: input, shape index: {}]   ;;  %s3942_s5 = inlined_call_operand.vmem [shape: f32[128,128], index: 5, kind: input, shape index: {}]   ;;  %s3943_s6 = inlined_call_operand.vmem [shape: bf16[128,128], index: 6, kind: input, shape index: {}]   ;;  %s3944_s7 = inlined_call_operand.vmem [shape: f32[128,128], index: 7, kind: input, shape index: {}]   ;;  %s3945_s8 = inlined_call_operand.vmem [shape: bf16[128,64], index: 8, kind: input, shape index: {}]   ;;  %s3946_s9 = inlined_call_operand.vmem [shape: f32[128,64], index: 9, kind: input, shape index: {}]   ;;  %s3947_s10 = inlined_call_operand.vmem [shape: bf16[64,64], index: 10, kind: input, shape index: {}]   ;;  %s3948_s11 = inlined_call_operand.vmem [shape: f32[128,64], index: 11, kind: input, shape index: {}]   ;;  %s3949_s12 = inlined_call_operand.vmem [shape: bf16[64,64], index: 12, kind: input, shape index: {}]   ;;  %s3950_s13 = inlined_call_operand.vmem [shape: f32[128,64], index: 13, kind: input, shape index: {}]   ;;  %s3951_s14 = inlined_call_operand.vmem [shape: bf16[64,8], index: 14, kind: input, shape index: {}]   ;;  %s3952_s15 = inlined_call_operand.vmem [shape: f32[128,8], index: 15, kind: input, shape index: {}]   ;;  %s3953_s16 = inlined_call_operand.vmem [shape: bf16[16,128], index: 16, kind: input, shape index: {}]   ;;  %s3954_s17 = inlined_call_operand.vmem [shape: f32[8,128], index: 17, kind: input, shape index: {}]   ;;  %s3955_s18 = inlined_call_operand.vmem [shape: f32[1,128], index: 18, kind: input, shape index: {}]   ;;  %s3956_s19 = inlined_call_operand.vmem [shape: f32[32,128], index: 19, kind: output, shape index: {}]  }
   0x1   :  { %3960 = sst [smem:[#allocation2_spill]] %s3937_s0  ;;  %s3181_s0 = smov 0  }
   0x2   :  { %3961 = sst [smem:[#allocation3_spill]] %s3938_s1 }
   0x3   :  { %3962 = sst [smem:[#allocation4_spill]] %s3939_s2 }
   0x4   :  { %3963 = sst [smem:[#allocation5_spill]] %s3940_s3 }
   0x5 LB: > { %s2522_s30 = sadd.s32 4294967295, %s3077_s0   ;;  %p2526_p0 = scmp.ge.s32.totalorder %s3077_s0, 1  ;;  %s3077_s0 = sphi %s3181_s0, %s29_s0  }
   0x6   : > { %p538_p1 = scmp.lt.s32.totalorder %s3077_s0, 3 }
   0x8   : > { %p539_p2 = pnand %p2526_p0, %p538_p1 }
   0x9   : > { %s3964_s1 = sld [smem:[#allocation4_spill]] (!%p539_p2)  ;;  %s2527_s23 = sshll.u32 (!%p539_p2), %s2522_s30, 4 }
   0xa   : > { %542 = sbr.rel (%p539_p2) target bundleno = 3358 (0xd1e), region = 96  ;;  %p595_p3 = scmp.lt.s32.totalorder (!%p539_p2), %s2527_s23, 31 }
   0xb   : > { %s3965_s24 = sld [smem:[#allocation2_spill]] (!%p539_p2) }
   0xc   : > { %s3966_s26 = sld [smem:[#allocation3_spill]] (!%p539_p2) }
   0xd   : > { %s3967_s3 = sld [smem:[#allocation5_spill]] (!%p539_p2) }
   0xf   : > { %v3000_v0 = vld [vmem:[%s3964_s1 + $0x28] sm:$0xff]  ;;  %v2999_v1 = vld [vmem:[%s3964_s1 + $0x20] sm:$0xff]  ;;  %v2998_v2 = vld [vmem:[%s3964_s1 + $0x18] sm:$0xff]  ;;  %s3977_s23 = smov (!%p595_p3, %s2527_s23), 31  ;;  %vm727_vm0 = vcmask 785408  }
  0x10   : > { %754 = vmatpush.bf16.msra.mxu0 %v3000_v0  ;;  %3038 = vmatpush.bf16.msra.mxu3 %v3000_v0  ;;  %v2997_v3 = vld [vmem:[%s3964_s1 + $0x10] sm:$0xff]  ;;  %v2996_v4 = vld [vmem:[%s3964_s1 + $0x8] sm:$0xff]  ;;  %s2528_s29 = sshll.u32 %s3977_s23, 2  ;;  %v2995_v5 = vld [vmem:[%s3964_s1] sm:$0xff]  ;;  %v3079_v60 = vmov 1.0|1.0  }
  0x11   : > { %s598_s25 = scalar_lea.vmem %s3965_s24, %s2528_s29  ;;  %v3008_v42 = vld [vmem:[%s3941_s4 + $0x38] sm:$0xff]  ;;  %v3007_v43 = vld [vmem:[%s3941_s4 + $0x30] sm:$0xff]  ;;  %v3006_v44 = vld [vmem:[%s3941_s4 + $0x28] sm:$0xff] }
  0x12   : > { %v2987_v6 = vld [vmem:[%s598_s25] sm:$0xff]  ;;  %v2992_v7 = vld [vmem:[%s598_s25 + $0x28] sm:$0xff]  ;;  %v2993_v9 = vld [vmem:[%s598_s25 + $0x30] sm:$0xff] }
  0x13   : > { %v2988_v8 = vld [vmem:[%s598_s25 + $0x8] sm:$0xff]  ;;  %v2989_v10 = vld [vmem:[%s598_s25 + $0x10] sm:$0xff]  ;;  %v2994_v11 = vld [vmem:[%s598_s25 + $0x38] sm:$0xff] }
  0x14   : > { %755 = vmatpush.bf16.msra.mxu0 %v2999_v1  ;;  %3039 = vmatpush.bf16.msra.mxu3 %v2999_v1  ;;  %v2990_v12 = vld [vmem:[%s598_s25 + $0x18] sm:$0xff]  ;;  %v2991_v13 = vld [vmem:[%s598_s25 + $0x20] sm:$0xff]  ;;  %v3221_v39 = vld [vmem:[%s3966_s26 + $0x8] sm:$0xff]  ;;  %s2529_s25 = sshll.u32 %s2522_s30, 1 }
  0x15   : > { %v3215_v38 = vld [vmem:[%s3966_s26] sm:$0xff]  ;;  %v3227_v40 = vld [vmem:[%s3966_s26 + $0x10] sm:$0xff]  ;;  %v3233_v41 = vld [vmem:[%s3966_s26 + $0x28] sm:$0xff]  ;;  %p601_p4 = scmp.lt.s32.totalorder %s2529_s25, 3 }
  0x16   : > { %v3248_v45 = vld [vmem:[%s3966_s26 + $0x18] sm:$0xff]  ;;  %v3005_v46 = vld [vmem:[%s3941_s4 + $0x20] sm:$0xff]  ;;  %v3256_v47 = vld [vmem:[%s3966_s26 + $0x30] sm:$0xff] }
  0x17   : > { %v3004_v48 = vld [vmem:[%s3941_s4 + $0x18] sm:$0xff]  ;;  %v3266_v49 = vld [vmem:[%s3966_s26 + $0x20] sm:$0xff]  ;;  %v3003_v51 = vld [vmem:[%s3941_s4 + $0x10] sm:$0xff]  ;;  %s3979_s25 = smov (!%p601_p4, %s2529_s25), 3 }
  0x18   : > { %756 = vmatpush.bf16.msra.mxu0 %v2998_v2  ;;  %3040 = vmatpush.bf16.msra.mxu3 %v2998_v2  ;;  %v3271_v50 = vld [vmem:[%s3966_s26 + $0x38] sm:$0xff]  ;;  %v3002_v52 = vld [vmem:[%s3941_s4 + $0x8] sm:$0xff]  ;;  %v3001_v53 = vld [vmem:[%s3941_s4] sm:$0xff]  ;;  %s2530_s23 = sshll.u32 %s3979_s25, 3 }
  0x19   : > { %v809_v55 = vld [vmem:[%s3967_s3] sm:$0xff]  ;;  %v810_v56 = vld [vmem:[%s3967_s3 + $0x8] sm:$0xff]  ;;  %v811_v62 = vld [vmem:[%s3967_s3 + $0x10] sm:$0xff]  ;;  %s604_s21 = scalar_lea.vmem %s3956_s19, %s2530_s23 }
  0x1a   : > { %v812_v63 = vld [vmem:[%s3967_s3 + $0x18] sm:$0xff] }
  0x1c   : > { %757 = vmatpush.bf16.msra.mxu0 %v2997_v3  ;;  %3041 = vmatpush.bf16.msra.mxu3 %v2997_v3 }
  0x20   : > { %758 = vmatpush.bf16.msra.mxu0 %v2996_v4  ;;  %3042 = vmatpush.bf16.msra.mxu3 %v2996_v4  ;;  %v813_v4 = vld [vmem:[%s3967_s3 + $0x20] sm:$0xff] }
  0x24   : > { %759 = vmatpush.bf16.msra.mxu0 %v2995_v5  ;;  %3043 = vmatpush.bf16.msra.mxu3 %v2995_v5  ;;  %v814_v5 = vld [vmem:[%s3967_s3 + $0x28] sm:$0xff] }
  0x27   : > { %2587 = vmatmul.msk.bf16.vlgmr.msra.gmra.mxu0 %vm727_vm0, %v2987_v6  ;;  %2592 = vmatmul.msk.bf16.vlgmr.msra.gmra.mxu3 %vm727_vm0, %v2992_v7 }
  0x37   : > { %2588 = vmatmul.msk.bf16.gmra.mxu0 %vm727_vm0, %v2988_v8  ;;  %2593 = vmatmul.msk.bf16.gmra.mxu3 %vm727_vm0, %v2993_v9 }
  0x47   : > { %2589 = vmatmul.msk.bf16.gmra.mxu0 %vm727_vm0, %v2989_v10  ;;  %2594 = vmatmul.msk.bf16.gmra.mxu3 %vm727_vm0, %v2994_v11  ;;  %v815_v10 = vld [vmem:[%s3967_s3 + $0x30] sm:$0xff]  ;;  %v816_v11 = vld [vmem:[%s3967_s3 + $0x38] sm:$0xff] }
  0x57   : > { %2590 = vmatmul.msk.bf16.gmra.mxu0 %vm727_vm0, %v2990_v12 }
  0x67   : > { %2591 = vmatmul.msk.bf16.gmra.mxu0 %vm727_vm0, %v2991_v13 }
  0xa4   : > { %v761_v14 = vpop.f32.mrf.mxu0 }
  0xaa   : > { %v786_v15 = vpop.f32.mrf.mxu3 }
  0xac   : > { %v763_v16 = vpop.f32.mrf.mxu0 }
  0xad   : > { %v801_v37 = vpack.c.bf16 %v763_v16, %v761_v14 }
  0xb2   : > { %v788_v17 = vpop.f32.mrf.mxu3 }
  0xb3   : > { %v806_v29 = vpack.c.bf16 %v788_v17, %v786_v15  ;;  %v817_v17 = vld [vmem:[%s3967_s3 + $0x40] sm:$0xff] }
  0xb4   : > { %v766_v18 = vpop.f32.mrf.mxu0 }
  0xba   : > { %v791_v19 = vpop.f32.mrf.mxu3 }
  0xbc   : > { %v768_v20 = vpop.f32.mrf.mxu0 }
  0xbd   : > { %v802_v36 = vpack.c.bf16 %v768_v20, %v766_v18  ;;  %v818_v18 = vld [vmem:[%s3967_s3 + $0x48] sm:$0xff] }
  0xc2   : > { %v793_v21 = vpop.f32.mrf.mxu3 }
  0xc3   : > { %v807_v28 = vpack.c.bf16 %v793_v21, %v791_v19 }
  0xc4   : > { %v771_v22 = vpop.f32.mrf.mxu0 }
  0xca   : > { %v796_v23 = vpop.f32.mrf.mxu3 }
  0xcc   : > { %v773_v24 = vpop.f32.mrf.mxu0 }
  0xcd   : > { %v803_v35 = vpack.c.bf16 %v773_v24, %v771_v22  ;;  %v820_v24 = vld [vmem:[%s3967_s3 + $0x58] sm:$0xff] }
  0xd2   : > { %v798_v25 = vpop.f32.mrf.mxu3 }
  0xd3   : > { %v808_v26 = vpack.c.bf16 %v798_v25, %v796_v23  ;;  %v819_v23 = vld [vmem:[%s3967_s3 + $0x50] sm:$0xff] }
  0xd4   : > { %v776_v27 = vpop.f32.mrf.mxu0 }
  0xd5   : > { %873 = vmatpush.bf16.msra.mxu1 %v808_v26  ;;  %3044 = vmatpush.bf16.msra.mxu2 %v808_v26 }
  0xd9   : > { %874 = vmatpush.bf16.msra.mxu1 %v807_v28  ;;  %3045 = vmatpush.bf16.msra.mxu2 %v807_v28 }
  0xdc   : > { %v778_v30 = vpop.f32.mrf.mxu0 }
  0xdd   : > { %875 = vmatpush.bf16.msra.mxu1 %v806_v29  ;;  %3046 = vmatpush.bf16.msra.mxu2 %v806_v29  ;;  %v804_v34 = vpack.c.bf16 %v778_v30, %v776_v27  ;;  %v821_v29 = vld [vmem:[%s3967_s3 + $0x60] sm:$0xff]  ;;  %v822_v30 = vld [vmem:[%s3967_s3 + $0x68] sm:$0xff] }
  0xe4   : > { %v781_v31 = vpop.f32.mrf.mxu0 }
  0xec   : > { %v783_v32 = vpop.f32.mrf.mxu0 }
  0xed   : > { %v805_v33 = vpack.c.bf16 %v783_v32, %v781_v31 }
  0xef   : > { %876 = vmatpush.bf16.msra.mxu1 %v805_v33  ;;  %3047 = vmatpush.bf16.msra.mxu2 %v805_v33 }
  0xf3   : > { %877 = vmatpush.bf16.msra.mxu1 %v804_v34  ;;  %3048 = vmatpush.bf16.msra.mxu2 %v804_v34  ;;  %v823_v34 = vld [vmem:[%s3967_s3 + $0x70] sm:$0xff] }
  0xf7   : > { %878 = vmatpush.bf16.msra.mxu1 %v803_v35  ;;  %3049 = vmatpush.bf16.msra.mxu2 %v803_v35  ;;  %v824_v35 = vld [vmem:[%s3967_s3 + $0x78] sm:$0xff] }
  0xfb   : > { %879 = vmatpush.bf16.msra.mxu1 %v802_v36  ;;  %3050 = vmatpush.bf16.msra.mxu2 %v802_v36 }
  0xff   : > { %880 = vmatpush.bf16.msra.mxu1 %v801_v37  ;;  %3051 = vmatpush.bf16.msra.mxu2 %v801_v37 }
 0x102   : > { %881 = vmatmul.bf16.vlgmr.msra.gmra.mxu1 %v3215_v38  ;;  %906 = vmatmul.bf16.vlgmr.msra.gmra.mxu2 %v3233_v41 }
 0x103   : > { %1042 = vmatpush.bf16.msrb.mxu2 %v3008_v42 }
 0x107   : > { %1043 = vmatpush.bf16.msrb.mxu2 %v3007_v43 }
 0x10b   : > { %1044 = vmatpush.bf16.msrb.mxu2 %v3006_v44 }
 0x10f   : > { %1045 = vmatpush.bf16.msrb.mxu2 %v3005_v46 }
 0x112   : > { %886 = vmatmul.bf16.gmra.mxu1 %v3221_v39  ;;  %911 = vmatmul.bf16.gmra.mxu2 %v3256_v47 }
 0x113   : > { %1046 = vmatpush.bf16.msrb.mxu2 %v3004_v48 }
 0x117   : > { %1047 = vmatpush.bf16.msrb.mxu2 %v3003_v51 }
 0x11b   : > { %1048 = vmatpush.bf16.msrb.mxu2 %v3002_v52 }
 0x11f   : > { %1049 = vmatpush.bf16.msrb.mxu2 %v3001_v53 }
 0x122   : > { %891 = vmatmul.bf16.gmra.mxu1 %v3227_v40  ;;  %916 = vmatmul.bf16.gmra.mxu2 %v3271_v50 }
 0x132   : > { %896 = vmatmul.bf16.gmra.mxu1 %v3248_v45 }
 0x142   : > { %901 = vmatmul.bf16.gmra.mxu1 %v3266_v49 }
 0x17f   : > { %v882_v54 = vpop.f32.mrf.mxu1 }
 0x180   : > { %v883_v57 = vadd.f32 %v882_v54, %v809_v55 }
 0x182   : > { %vm922_vm1 = vcmp.ge.f32.partialorder %v883_v57, 0.0 }
 0x185   : > { %v907_v16 = vpop.f32.mrf.mxu2 }
 0x186   : > { %v908_v26 = vadd.f32 %v907_v16, %v819_v23  ;;  %v1101_v23 = vld [vmem:[%s3942_s5 + $0x10] sm:$0xff] }
 0x187   : > { %v884_v58 = vpop.f32.mrf.mxu1 }
 0x188   : > { %v885_v59 = vadd.f32 %v884_v58, %v810_v56  ;;  %vm932_vm0 = vcmp.ge.f32.partialorder %v908_v26, 0.0 }
 0x18a   : > { %vm923_vm2 = vcmp.ge.f32.partialorder %v885_v59, 0.0 }
 0x18b   : > { %vm2675_vm3 = vmpackc.low %vm923_vm2, %vm922_vm1 }
 0x18c   : > { %2676 = vmatmul.msk.bf16.vlgmr.msrb.gmra.mxu2 %vm2675_vm3, %v3079_v60 }
 0x18d   : > { %v909_v22 = vpop.f32.mrf.mxu2 }
 0x18e   : > { %v910_v27 = vadd.f32 %v909_v22, %v820_v24  ;;  %v1102_v24 = vld [vmem:[%s3942_s5 + $0x18] sm:$0xff] }
 0x18f   : > { %v887_v61 = vpop.f32.mrf.mxu1 }
 0x190   : > { %v888_v0 = vadd.f32 %v887_v61, %v811_v62  ;;  %vm933_vm1 = vcmp.ge.f32.partialorder %v910_v27, 0.0 }
 0x191   : > { %vm2685_vm2 = vmpackc.low %vm933_vm1, %vm932_vm0 }
 0x192   : > { %vm924_vm4 = vcmp.ge.f32.partialorder %v888_v0, 0.0 }
 0x195   : > { %v912_v25 = vpop.f32.mrf.mxu2 }
 0x196   : > { %v913_v31 = vadd.f32 %v912_v25, %v821_v29  ;;  %v1103_v29 = vld [vmem:[%s3942_s5 + $0x20] sm:$0xff] }
 0x197   : > { %v889_v1 = vpop.f32.mrf.mxu1 }
 0x198   : > { %v890_v2 = vadd.f32 %v889_v1, %v812_v63  ;;  %vm934_vm3 = vcmp.ge.f32.partialorder %v913_v31, 0.0 }
 0x19a   : > { %vm925_vm5 = vcmp.ge.f32.partialorder %v890_v2, 0.0 }
 0x19b   : > { %vm2677_vm6 = vmpackc.low %vm925_vm5, %vm924_vm4 }
 0x19c   : > { %2678 = vmatmul.msk.bf16.gmra.mxu2 %vm2677_vm6, %v3079_v60 }
 0x19d   : > { %v914_v28 = vpop.f32.mrf.mxu2 }
 0x19e   : > { %v915_v32 = vadd.f32 %v914_v28, %v822_v30  ;;  %v1104_v30 = vld [vmem:[%s3942_s5 + $0x28] sm:$0xff] }
 0x19f   : > { %v892_v3 = vpop.f32.mrf.mxu1 }
 0x1a0   : > { %v893_v6 = vadd.f32 %v892_v3, %v813_v4  ;;  %vm935_vm4 = vcmp.ge.f32.partialorder %v915_v32, 0.0 }
 0x1a1   : > { %vm2687_vm5 = vmpackc.low %vm935_vm4, %vm934_vm3 }
 0x1a2   : > { %vm926_vm7 = vcmp.ge.f32.partialorder %v893_v6, 0.0 }
 0x1a5   : > { %v917_v33 = vpop.f32.mrf.mxu2 }
 0x1a6   : > { %v918_v37 = vadd.f32 %v917_v33, %v823_v34 }
 0x1a7   : > { %v894_v7 = vpop.f32.mrf.mxu1 }
 0x1a8   : > { %v895_v8 = vadd.f32 %v894_v7, %v814_v5  ;;  %vm936_vm6 = vcmp.ge.f32.partialorder %v918_v37, 0.0 }
 0x1aa   : > { %vm927_vm8 = vcmp.ge.f32.partialorder %v895_v8, 0.0  ;;  %v3016_v8 = vld [vmem:[%s3943_s6 + $0x38] sm:$0xff] }
 0x1ab   : > { %vm2679_vm9 = vmpackc.low %vm927_vm8, %vm926_vm7  ;;  %1284 = vmatpush.bf16.msrb.mxu0 %v3016_v8 }
 0x1ac   : > { %2680 = vmatmul.msk.bf16.gmra.mxu2 %vm2679_vm9, %v3079_v60 }
 0x1ad   : > { %v919_v36 = vpop.f32.mrf.mxu2 }
 0x1ae   : > { %v920_v42 = vadd.f32 %v919_v36, %v824_v35  ;;  %v1105_v35 = vld [vmem:[%s3942_s5 + $0x30] sm:$0xff]  ;;  %v1106_v36 = vld [vmem:[%s3942_s5 + $0x38] sm:$0xff] }
 0x1af   : > { %v897_v9 = vpop.f32.mrf.mxu1 }
 0x1b0   : > { %v898_v12 = vadd.f32 %v897_v9, %v815_v10  ;;  %vm937_vm7 = vcmp.ge.f32.partialorder %v920_v42, 0.0  ;;  %v3015_v9 = vld [vmem:[%s3943_s6 + $0x30] sm:$0xff]  ;;  %v3014_v10 = vld [vmem:[%s3943_s6 + $0x28] sm:$0xff] }
 0x1b1   : > { %vm2689_vm8 = vmpackc.low %vm937_vm7, %vm936_vm6  ;;  %1285 = vmatpush.bf16.msrb.mxu0 %v3015_v9 }
 0x1b2   : > { %vm928_vm10 = vcmp.ge.f32.partialorder %v898_v12, 0.0  ;;  %v3012_v12 = vld [vmem:[%s3943_s6 + $0x18] sm:$0xff] }
 0x1b5   : > { %1286 = vmatpush.bf16.msrb.mxu0 %v3014_v10 }
 0x1b7   : > { %v899_v13 = vpop.f32.mrf.mxu1 }
 0x1b8   : > { %v900_v14 = vadd.f32 %v899_v13, %v816_v11  ;;  %v3013_v11 = vld [vmem:[%s3943_s6 + $0x20] sm:$0xff]  ;;  %v3011_v13 = vld [vmem:[%s3943_s6 + $0x10] sm:$0xff] }
 0x1b9   : > { %1287 = vmatpush.bf16.msrb.mxu0 %v3013_v11 }
 0x1ba   : > { %vm929_vm11 = vcmp.ge.f32.partialorder %v900_v14, 0.0  ;;  %v3010_v14 = vld [vmem:[%s3943_s6 + $0x8] sm:$0xff] }
 0x1bb   : > { %vm2681_vm12 = vmpackc.low %vm929_vm11, %vm928_vm10 }
 0x1bc   : > { %2682 = vmatmul.msk.bf16.gmra.mxu2 %vm2681_vm12, %v3079_v60 }
 0x1bd   : > { %1288 = vmatpush.bf16.msrb.mxu0 %v3012_v12 }
 0x1bf   : > { %v902_v15 = vpop.f32.mrf.mxu1 }
 0x1c0   : > { %v903_v19 = vadd.f32 %v902_v15, %v817_v17  ;;  %v3009_v15 = vld [vmem:[%s3943_s6] sm:$0xff] }
 0x1c1   : > { %1289 = vmatpush.bf16.msrb.mxu0 %v3011_v13  ;;  %v1099_v17 = vld [vmem:[%s3942_s5] sm:$0xff] }
 0x1c2   : > { %vm930_vm13 = vcmp.ge.f32.partialorder %v903_v19, 0.0 }
 0x1c5   : > { %1290 = vmatpush.bf16.msrb.mxu0 %v3010_v14 }
 0x1c7   : > { %v904_v20 = vpop.f32.mrf.mxu1 }
 0x1c8   : > { %v905_v21 = vadd.f32 %v904_v20, %v818_v18  ;;  %v1100_v18 = vld [vmem:[%s3942_s5 + $0x8] sm:$0xff] }
 0x1c9   : > { %1291 = vmatpush.bf16.msrb.mxu0 %v3009_v15 }
 0x1ca   : > { %vm931_vm14 = vcmp.ge.f32.partialorder %v905_v21, 0.0 }
 0x1cb   : > { %vm2683_vm15 = vmpackc.low %vm931_vm14, %vm930_vm13 }
 0x1cc   : > { %2684 = vmatmul.msk.bf16.gmra.mxu2 %vm2683_vm15, %v3079_v60 }
 0x1dc   : > { %2686 = vmatmul.msk.bf16.gmra.mxu2 %vm2685_vm2, %v3079_v60 }
 0x1ec   : > { %2688 = vmatmul.msk.bf16.gmra.mxu2 %vm2687_vm5, %v3079_v60 }
 0x1fc   : > { %2690 = vmatmul.msk.bf16.gmra.mxu2 %vm2689_vm8, %v3079_v60 }
 0x20f   : > { %v1051_v43 = vpop.f32.mrf.mxu2 }
 0x217   : > { %v1053_v44 = vpop.f32.mrf.mxu2 }
 0x218   : > { %v1091_v7 = vpack.c.bf16 %v1053_v44, %v1051_v43 }
 0x21f   : > { %v1056_v46 = vpop.f32.mrf.mxu2 }
 0x227   : > { %v1058_v48 = vpop.f32.mrf.mxu2 }
 0x228   : > { %v1092_v6 = vpack.c.bf16 %v1058_v48, %v1056_v46  ;;  %v1107_v46 = vld [vmem:[%s3942_s5 + $0x40] sm:$0xff]  ;;  %v1108_v48 = vld [vmem:[%s3942_s5 + $0x48] sm:$0xff] }
 0x22f   : > { %v1061_v51 = vpop.f32.mrf.mxu2 }
 0x237   : > { %v1063_v52 = vpop.f32.mrf.mxu2 }
 0x238   : > { %v1093_v5 = vpack.c.bf16 %v1063_v52, %v1061_v51 }
 0x23f   : > { %v1066_v53 = vpop.f32.mrf.mxu2 }
 0x247   : > { %v1068_v54 = vpop.f32.mrf.mxu2 }
 0x248   : > { %v1094_v4 = vpack.c.bf16 %v1068_v54, %v1066_v53 }
 0x24f   : > { %v1071_v55 = vpop.f32.mrf.mxu2 }
 0x257   : > { %v1073_v56 = vpop.f32.mrf.mxu2 }
 0x258   : > { %v1095_v3 = vpack.c.bf16 %v1073_v56, %v1071_v55  ;;  %v1109_v55 = vld [vmem:[%s3942_s5 + $0x50] sm:$0xff]  ;;  %v1110_v56 = vld [vmem:[%s3942_s5 + $0x58] sm:$0xff] }
 0x25f   : > { %v1076_v57 = vpop.f32.mrf.mxu2 }
 0x267   : > { %v1078_v58 = vpop.f32.mrf.mxu2 }
 0x268   : > { %v1096_v2 = vpack.c.bf16 %v1078_v58, %v1076_v57 }
 0x26f   : > { %v1081_v59 = vpop.f32.mrf.mxu2 }
 0x277   : > { %v1083_v61 = vpop.f32.mrf.mxu2 }
 0x278   : > { %v1097_v1 = vpack.c.bf16 %v1083_v61, %v1081_v59 }
 0x27f   : > { %v1086_v62 = vpop.f32.mrf.mxu2 }
 0x287   : > { %v1088_v63 = vpop.f32.mrf.mxu2 }
 0x288   : > { %v1098_v0 = vpack.c.bf16 %v1088_v63, %v1086_v62  ;;  %v1111_v62 = vld [vmem:[%s3942_s5 + $0x60] sm:$0xff]  ;;  %v1112_v63 = vld [vmem:[%s3942_s5 + $0x68] sm:$0xff] }
 0x28a   : > { %1115 = vmatpush.bf16.msrb.mxu3 %v1098_v0 }
 0x28e   : > { %1116 = vmatpush.bf16.msrb.mxu3 %v1097_v1 }
 0x292   : > { %1117 = vmatpush.bf16.msrb.mxu3 %v1096_v2 }
 0x296   : > { %1118 = vmatpush.bf16.msrb.mxu3 %v1095_v3 }
 0x29a   : > { %1119 = vmatpush.bf16.msrb.mxu3 %v1094_v4  ;;  %v1113_v4 = vld [vmem:[%s3942_s5 + $0x70] sm:$0xff] }
 0x29e   : > { %1120 = vmatpush.bf16.msrb.mxu3 %v1093_v5  ;;  %v1114_v5 = vld [vmem:[%s3942_s5 + $0x78] sm:$0xff] }
 0x2a2   : > { %1121 = vmatpush.bf16.msrb.mxu3 %v1092_v6 }
 0x2a6   : > { %1122 = vmatpush.bf16.msrb.mxu3 %v1091_v7 }
 0x2a9   : > { %1123 = vmatmul.bf16.vlgmr.msrb.gmra.mxu3 %v3215_v38 }
 0x2b9   : > { %1128 = vmatmul.bf16.gmra.mxu3 %v3221_v39 }
 0x2c9   : > { %1133 = vmatmul.bf16.gmra.mxu3 %v3227_v40 }
 0x2d9   : > { %1138 = vmatmul.bf16.gmra.mxu3 %v3248_v45 }
 0x2e9   : > { %1143 = vmatmul.bf16.gmra.mxu3 %v3266_v49 }
 0x2f9   : > { %1148 = vmatmul.bf16.gmra.mxu3 %v3233_v41 }
 0x309   : > { %1153 = vmatmul.bf16.gmra.mxu3 %v3256_v47 }
 0x319   : > { %1158 = vmatmul.bf16.gmra.mxu3 %v3271_v50 }
 0x32c   : > { %v1124_v16 = vpop.f32.mrf.mxu3 }
 0x32d   : > { %v1125_v19 = vadd.f32 %v1124_v16, %v1099_v17 }
 0x32f   : > { %vm1164_vm9 = vcmp.ge.f32.partialorder %v1125_v19, 0.0 }
 0x334   : > { %v1126_v20 = vpop.f32.mrf.mxu3 }
 0x335   : > { %v1127_v21 = vadd.f32 %v1126_v20, %v1100_v18 }
 0x337   : > { %vm1165_vm10 = vcmp.ge.f32.partialorder %v1127_v21, 0.0 }
 0x338   : > { %vm2739_vm11 = vmpackc.low %vm1165_vm10, %vm1164_vm9 }
 0x339   : > { %2740 = vmatmul.msk.bf16.vlgmr.msrb.gmra.mxu0 %vm2739_vm11, %v3079_v60 }
 0x33c   : > { %v1129_v22 = vpop.f32.mrf.mxu3 }
 0x33d   : > { %v1130_v25 = vadd.f32 %v1129_v22, %v1101_v23 }
 0x33f   : > { %vm1166_vm12 = vcmp.ge.f32.partialorder %v1130_v25, 0.0 }
 0x344   : > { %v1131_v26 = vpop.f32.mrf.mxu3 }
 0x345   : > { %v1132_v27 = vadd.f32 %v1131_v26, %v1102_v24 }
 0x347   : > { %vm1167_vm13 = vcmp.ge.f32.partialorder %v1132_v27, 0.0 }
 0x348   : > { %vm2741_vm14 = vmpackc.low %vm1167_vm13, %vm1166_vm12 }
 0x349   : > { %2742 = vmatmul.msk.bf16.gmra.mxu0 %vm2741_vm14, %v3079_v60 }
 0x34c   : > { %v1134_v28 = vpop.f32.mrf.mxu3 }
 0x34d   : > { %v1135_v31 = vadd.f32 %v1134_v28, %v1103_v29 }
 0x34f   : > { %vm1168_vm15 = vcmp.ge.f32.partialorder %v1135_v31, 0.0 }
 0x354   : > { %v1136_v32 = vpop.f32.mrf.mxu3 }
 0x355   : > { %v1137_v33 = vadd.f32 %v1136_v32, %v1104_v30 }
 0x357   : > { %vm1169_vm0 = vcmp.ge.f32.partialorder %v1137_v33, 0.0  ;;  %v3024_v33 = vld [vmem:[%s3945_s8 + $0x38] sm:$0xff] }
 0x358   : > { %vm2743_vm1 = vmpackc.low %vm1169_vm0, %vm1168_vm15  ;;  %1526 = vmatpush.bf16.msra.mxu2 %v3024_v33 }
 0x359   : > { %2744 = vmatmul.msk.bf16.gmra.mxu0 %vm2743_vm1, %v3079_v60 }
 0x35c   : > { %v1139_v34 = vpop.f32.mrf.mxu3 }
 0x35d   : > { %v1140_v37 = vadd.f32 %v1139_v34, %v1105_v35  ;;  %v3023_v34 = vld [vmem:[%s3945_s8 + $0x30] sm:$0xff]  ;;  %v3022_v35 = vld [vmem:[%s3945_s8 + $0x28] sm:$0xff] }
 0x35e   : > { %1527 = vmatpush.bf16.msra.mxu2 %v3023_v34 }
 0x35f   : > { %vm1170_vm2 = vcmp.ge.f32.partialorder %v1140_v37, 0.0  ;;  %v3020_v37 = vld [vmem:[%s3945_s8 + $0x18] sm:$0xff] }
 0x362   : > { %1528 = vmatpush.bf16.msra.mxu2 %v3022_v35 }
 0x364   : > { %v1141_v42 = vpop.f32.mrf.mxu3 }
 0x365   : > { %v1142_v43 = vadd.f32 %v1141_v42, %v1106_v36  ;;  %v3021_v36 = vld [vmem:[%s3945_s8 + $0x20] sm:$0xff]  ;;  %v3019_v42 = vld [vmem:[%s3945_s8 + $0x10] sm:$0xff] }
 0x366   : > { %1529 = vmatpush.bf16.msra.mxu2 %v3021_v36 }
 0x367   : > { %vm1171_vm3 = vcmp.ge.f32.partialorder %v1142_v43, 0.0  ;;  %v3018_v43 = vld [vmem:[%s3945_s8 + $0x8] sm:$0xff] }
 0x368   : > { %vm2745_vm4 = vmpackc.low %vm1171_vm3, %vm1170_vm2 }
 0x369   : > { %2746 = vmatmul.msk.bf16.gmra.mxu0 %vm2745_vm4, %v3079_v60 }
 0x36a   : > { %1530 = vmatpush.bf16.msra.mxu2 %v3020_v37 }
 0x36c   : > { %v1144_v44 = vpop.f32.mrf.mxu3 }
 0x36d   : > { %v1145_v51 = vadd.f32 %v1144_v44, %v1107_v46  ;;  %v3017_v44 = vld [vmem:[%s3945_s8] sm:$0xff] }
 0x36e   : > { %1531 = vmatpush.bf16.msra.mxu2 %v3019_v42 }
 0x36f   : > { %vm1172_vm5 = vcmp.ge.f32.partialorder %v1145_v51, 0.0  ;;  %v1342_v51 = vld [vmem:[%s3944_s7 + $0x8] sm:$0xff] }
 0x372   : > { %1532 = vmatpush.bf16.msra.mxu2 %v3018_v43 }
 0x374   : > { %v1146_v52 = vpop.f32.mrf.mxu3 }
 0x375   : > { %v1147_v53 = vadd.f32 %v1146_v52, %v1108_v48  ;;  %v1341_v48 = vld [vmem:[%s3944_s7] sm:$0xff] }
 0x376   : > { %1533 = vmatpush.bf16.msra.mxu2 %v3017_v44 }
 0x377   : > { %vm1173_vm6 = vcmp.ge.f32.partialorder %v1147_v53, 0.0 }
 0x378   : > { %vm2747_vm7 = vmpackc.low %vm1173_vm6, %vm1172_vm5 }
 0x379   : > { %2748 = vmatmul.msk.bf16.gmra.mxu0 %vm2747_vm7, %v3079_v60 }
 0x37c   : > { %v1149_v54 = vpop.f32.mrf.mxu3 }
 0x37d   : > { %v1150_v57 = vadd.f32 %v1149_v54, %v1109_v55 }
 0x37f   : > { %vm1174_vm8 = vcmp.ge.f32.partialorder %v1150_v57, 0.0  ;;  %v1344_v57 = vld [vmem:[%s3944_s7 + $0x18] sm:$0xff] }
 0x384   : > { %v1151_v58 = vpop.f32.mrf.mxu3 }
 0x385   : > { %v1152_v59 = vadd.f32 %v1151_v58, %v1110_v56  ;;  %v1343_v56 = vld [vmem:[%s3944_s7 + $0x10] sm:$0xff] }
 0x387   : > { %vm1175_vm9 = vcmp.ge.f32.partialorder %v1152_v59, 0.0 }
 0x388   : > { %vm2749_vm10 = vmpackc.low %vm1175_vm9, %vm1174_vm8 }
 0x389   : > { %2750 = vmatmul.msk.bf16.gmra.mxu0 %vm2749_vm10, %v3079_v60 }
 0x38c   : > { %v1154_v61 = vpop.f32.mrf.mxu3 }
 0x38d   : > { %v1155_v0 = vadd.f32 %v1154_v61, %v1111_v62 }
 0x38f   : > { %vm1176_vm11 = vcmp.ge.f32.partialorder %v1155_v0, 0.0  ;;  %v1346_v0 = vld [vmem:[%s3944_s7 + $0x28] sm:$0xff] }
 0x394   : > { %v1156_v1 = vpop.f32.mrf.mxu3 }
 0x395   : > { %v1157_v2 = vadd.f32 %v1156_v1, %v1112_v63  ;;  %v1345_v63 = vld [vmem:[%s3944_s7 + $0x20] sm:$0xff] }
 0x397   : > { %vm1177_vm12 = vcmp.ge.f32.partialorder %v1157_v2, 0.0 }
 0x398   : > { %vm2751_vm13 = vmpackc.low %vm1177_vm12, %vm1176_vm11 }
 0x399   : > { %2752 = vmatmul.msk.bf16.gmra.mxu0 %vm2751_vm13, %v3079_v60 }
 0x39c   : > { %v1159_v3 = vpop.f32.mrf.mxu3 }
 0x39d   : > { %v1160_v6 = vadd.f32 %v1159_v3, %v1113_v4 }
 0x39f   : > { %vm1178_vm14 = vcmp.ge.f32.partialorder %v1160_v6, 0.0  ;;  %v1348_v6 = vld [vmem:[%s3944_s7 + $0x38] sm:$0xff] }
 0x3a4   : > { %v1161_v7 = vpop.f32.mrf.mxu3 }
 0x3a5   : > { %v1162_v8 = vadd.f32 %v1161_v7, %v1114_v5  ;;  %v1347_v5 = vld [vmem:[%s3944_s7 + $0x30] sm:$0xff] }
 0x3a7   : > { %vm1179_vm15 = vcmp.ge.f32.partialorder %v1162_v8, 0.0 }
 0x3a8   : > { %vm2753_vm0 = vmpackc.low %vm1179_vm15, %vm1178_vm14 }
 0x3a9   : > { %2754 = vmatmul.msk.bf16.gmra.mxu0 %vm2753_vm0, %v3079_v60 }
 0x3b6   : > { %v1293_v9 = vpop.f32.mrf.mxu0 }
 0x3be   : > { %v1295_v10 = vpop.f32.mrf.mxu0 }
 0x3bf   : > { %v1333_v32 = vpack.c.bf16 %v1295_v10, %v1293_v9 }
 0x3c6   : > { %v1298_v11 = vpop.f32.mrf.mxu0 }
 0x3ce   : > { %v1300_v12 = vpop.f32.mrf.mxu0 }
 0x3cf   : > { %v1334_v31 = vpack.c.bf16 %v1300_v12, %v1298_v11  ;;  %v1349_v11 = vld [vmem:[%s3944_s7 + $0x40] sm:$0xff]  ;;  %v1350_v12 = vld [vmem:[%s3944_s7 + $0x48] sm:$0xff] }
 0x3d6   : > { %v1303_v13 = vpop.f32.mrf.mxu0 }
 0x3de   : > { %v1305_v14 = vpop.f32.mrf.mxu0 }
 0x3df   : > { %v1335_v30 = vpack.c.bf16 %v1305_v14, %v1303_v13 }
 0x3e6   : > { %v1308_v15 = vpop.f32.mrf.mxu0 }
 0x3ee   : > { %v1310_v16 = vpop.f32.mrf.mxu0 }
 0x3ef   : > { %v1336_v29 = vpack.c.bf16 %v1310_v16, %v1308_v15 }
 0x3f6   : > { %v1313_v17 = vpop.f32.mrf.mxu0 }
 0x3fe   : > { %v1315_v18 = vpop.f32.mrf.mxu0 }
 0x3ff   : > { %v1337_v28 = vpack.c.bf16 %v1315_v18, %v1313_v17  ;;  %v1351_v17 = vld [vmem:[%s3944_s7 + $0x50] sm:$0xff]  ;;  %v1352_v18 = vld [vmem:[%s3944_s7 + $0x58] sm:$0xff] }
 0x406   : > { %v1318_v19 = vpop.f32.mrf.mxu0 }
 0x40e   : > { %v1320_v20 = vpop.f32.mrf.mxu0 }
 0x40f   : > { %v1338_v27 = vpack.c.bf16 %v1320_v20, %v1318_v19 }
 0x416   : > { %v1323_v21 = vpop.f32.mrf.mxu0 }
 0x41e   : > { %v1325_v22 = vpop.f32.mrf.mxu0 }
 0x41f   : > { %v1339_v26 = vpack.c.bf16 %v1325_v22, %v1323_v21 }
 0x426   : > { %v1328_v23 = vpop.f32.mrf.mxu0 }
 0x42e   : > { %v1330_v24 = vpop.f32.mrf.mxu0 }
 0x42f   : > { %v1340_v25 = vpack.c.bf16 %v1330_v24, %v1328_v23  ;;  %v1353_v23 = vld [vmem:[%s3944_s7 + $0x60] sm:$0xff]  ;;  %v1354_v24 = vld [vmem:[%s3944_s7 + $0x68] sm:$0xff] }
 0x431   : > { %1357 = vmatpush.bf16.msrb.mxu1 %v1340_v25 }
 0x435   : > { %1358 = vmatpush.bf16.msrb.mxu1 %v1339_v26 }
 0x439   : > { %1359 = vmatpush.bf16.msrb.mxu1 %v1338_v27 }
 0x43d   : > { %1360 = vmatpush.bf16.msrb.mxu1 %v1337_v28 }
 0x441   : > { %1361 = vmatpush.bf16.msrb.mxu1 %v1336_v29  ;;  %v1355_v29 = vld [vmem:[%s3944_s7 + $0x70] sm:$0xff] }
 0x445   : > { %1362 = vmatpush.bf16.msrb.mxu1 %v1335_v30  ;;  %v1356_v30 = vld [vmem:[%s3944_s7 + $0x78] sm:$0xff] }
 0x449   : > { %1363 = vmatpush.bf16.msrb.mxu1 %v1334_v31 }
 0x44d   : > { %1364 = vmatpush.bf16.msrb.mxu1 %v1333_v32 }
 0x450   : > { %1365 = vmatmul.bf16.vlgmr.msrb.gmra.mxu1 %v3215_v38 }
 0x460   : > { %1370 = vmatmul.bf16.gmra.mxu1 %v3221_v39 }
 0x470   : > { %1375 = vmatmul.bf16.gmra.mxu1 %v3227_v40 }
 0x480   : > { %1380 = vmatmul.bf16.gmra.mxu1 %v3248_v45 }
 0x490   : > { %1385 = vmatmul.bf16.gmra.mxu1 %v3266_v49 }
 0x4a0   : > { %1390 = vmatmul.bf16.gmra.mxu1 %v3233_v41 }
 0x4b0   : > { %1395 = vmatmul.bf16.gmra.mxu1 %v3256_v47 }
 0x4c0   : > { %1400 = vmatmul.bf16.gmra.mxu1 %v3271_v50 }
 0x4cd   : > { %v1366_v46 = vpop.f32.mrf.mxu1 }
 0x4ce   : > { %v1367_v52 = vadd.f32 %v1366_v46, %v1341_v48 }
 0x4d0   : > { %vm1406_vm1 = vcmp.ge.f32.partialorder %v1367_v52, 0.0 }
 0x4d5   : > { %v1368_v53 = vpop.f32.mrf.mxu1 }
 0x4d6   : > { %v1369_v54 = vadd.f32 %v1368_v53, %v1342_v51 }
 0x4d8   : > { %vm1407_vm2 = vcmp.ge.f32.partialorder %v1369_v54, 0.0 }
 0x4d9   : > { %vm2803_vm3 = vmpackc.low %vm1407_vm2, %vm1406_vm1 }
 0x4da   : > { %2804 = vmatmul.msk.bf16.vlgmr.msra.gmra.mxu2 %vm2803_vm3, %v3079_v60 }
 0x4dd   : > { %v1371_v55 = vpop.f32.mrf.mxu1 }
 0x4de   : > { %v1372_v58 = vadd.f32 %v1371_v55, %v1343_v56 }
 0x4e0   : > { %vm1408_vm4 = vcmp.ge.f32.partialorder %v1372_v58, 0.0 }
 0x4e5   : > { %v1373_v59 = vpop.f32.mrf.mxu1 }
 0x4e6   : > { %v1374_v61 = vadd.f32 %v1373_v59, %v1344_v57 }
 0x4e8   : > { %vm1409_vm5 = vcmp.ge.f32.partialorder %v1374_v61, 0.0 }
 0x4e9   : > { %vm2805_vm6 = vmpackc.low %vm1409_vm5, %vm1408_vm4 }
 0x4ea   : > { %2806 = vmatmul.msk.bf16.gmra.mxu2 %vm2805_vm6, %v3079_v60 }
 0x4ed   : > { %v1376_v62 = vpop.f32.mrf.mxu1 }
 0x4ee   : > { %v1377_v1 = vadd.f32 %v1376_v62, %v1345_v63 }
 0x4f0   : > { %vm1410_vm7 = vcmp.ge.f32.partialorder %v1377_v1, 0.0 }
 0x4f5   : > { %v1378_v2 = vpop.f32.mrf.mxu1 }
 0x4f6   : > { %v1379_v3 = vadd.f32 %v1378_v2, %v1346_v0 }
 0x4f8   : > { %vm1411_vm8 = vcmp.ge.f32.partialorder %v1379_v3, 0.0  ;;  %v3028_v3 = vld [vmem:[%s3947_s10 + $0x18] sm:$0xff] }
 0x4f9   : > { %vm2807_vm9 = vmpackc.low %vm1411_vm8, %vm1410_vm7  ;;  %1765 = vmatpush.bf16.msra.mxu0 %v3028_v3 }
 0x4fa   : > { %2808 = vmatmul.msk.bf16.gmra.mxu2 %vm2807_vm9, %v3079_v60 }
 0x4fd   : > { %v1381_v4 = vpop.f32.mrf.mxu1 }
 0x4fe   : > { %v1382_v7 = vadd.f32 %v1381_v4, %v1347_v5 }
 0x500   : > { %vm1412_vm10 = vcmp.ge.f32.partialorder %v1382_v7, 0.0 }
 0x505   : > { %v1383_v8 = vpop.f32.mrf.mxu1 }
 0x506   : > { %v1384_v9 = vadd.f32 %v1383_v8, %v1348_v6  ;;  %v3080_v6 = vmov 0.0  }
 0x508   : > { %vm1413_vm11 = vcmp.ge.f32.partialorder %v1384_v9, 0.0 }
 0x509   : > { %vm2809_vm12 = vmpackc.low %vm1413_vm11, %vm1412_vm10  ;;  %vm1736_vm11 = vcmask 523264  }
 0x50a   : > { %2810 = vmatmul.msk.bf16.gmra.mxu2 %vm2809_vm12, %v3079_v60 }
 0x50d   : > { %v1386_v10 = vpop.f32.mrf.mxu1 }
 0x50e   : > { %v1387_v13 = vadd.f32 %v1386_v10, %v1349_v11  ;;  %v1585_v10 = vld [vmem:[%s3946_s9 + $0x10] sm:$0xff] }
 0x510   : > { %vm1414_vm13 = vcmp.ge.f32.partialorder %v1387_v13, 0.0 }
 0x515   : > { %v1388_v14 = vpop.f32.mrf.mxu1 }
 0x516   : > { %v1389_v15 = vadd.f32 %v1388_v14, %v1350_v12  ;;  %v1586_v12 = vld [vmem:[%s3946_s9 + $0x18] sm:$0xff] }
 0x518   : > { %vm1415_vm14 = vcmp.ge.f32.partialorder %v1389_v15, 0.0 }
 0x519   : > { %vm2811_vm15 = vmpackc.low %vm1415_vm14, %vm1414_vm13 }
 0x51a   : > { %2812 = vmatmul.msk.bf16.gmra.mxu2 %vm2811_vm15, %v3079_v60 }
 0x51d   : > { %v1391_v16 = vpop.f32.mrf.mxu1 }
 0x51e   : > { %v1392_v19 = vadd.f32 %v1391_v16, %v1351_v17 }
 0x520   : > { %vm1416_vm0 = vcmp.ge.f32.partialorder %v1392_v19, 0.0  ;;  %v1587_v19 = vld [vmem:[%s3946_s9 + $0x20] sm:$0xff] }
 0x525   : > { %v1393_v20 = vpop.f32.mrf.mxu1 }
 0x526   : > { %v1394_v21 = vadd.f32 %v1393_v20, %v1352_v18 }
 0x528   : > { %vm1417_vm1 = vcmp.ge.f32.partialorder %v1394_v21, 0.0  ;;  %v1588_v21 = vld [vmem:[%s3946_s9 + $0x28] sm:$0xff] }
 0x529   : > { %vm2813_vm2 = vmpackc.low %vm1417_vm1, %vm1416_vm0 }
 0x52a   : > { %2814 = vmatmul.msk.bf16.gmra.mxu2 %vm2813_vm2, %v3079_v60 }
 0x52d   : > { %v1396_v22 = vpop.f32.mrf.mxu1 }
 0x52e   : > { %v1397_v25 = vadd.f32 %v1396_v22, %v1353_v23 }
 0x530   : > { %vm1418_vm3 = vcmp.ge.f32.partialorder %v1397_v25, 0.0 }
 0x535   : > { %v1398_v26 = vpop.f32.mrf.mxu1 }
 0x536   : > { %v1399_v27 = vadd.f32 %v1398_v26, %v1354_v24 }
 0x538   : > { %vm1419_vm4 = vcmp.ge.f32.partialorder %v1399_v27, 0.0 }
 0x539   : > { %vm2815_vm5 = vmpackc.low %vm1419_vm4, %vm1418_vm3 }
 0x53a   : > { %2816 = vmatmul.msk.bf16.gmra.mxu2 %vm2815_vm5, %v3079_v60 }
 0x53d   : > { %v1401_v28 = vpop.f32.mrf.mxu1 }
 0x53e   : > { %v1402_v31 = vadd.f32 %v1401_v28, %v1355_v29  ;;  %v1589_v28 = vld [vmem:[%s3946_s9 + $0x30] sm:$0xff] }
 0x540   : > { %vm1420_vm6 = vcmp.ge.f32.partialorder %v1402_v31, 0.0 }
 0x545   : > { %v1403_v32 = vpop.f32.mrf.mxu1 }
 0x546   : > { %v1404_v33 = vadd.f32 %v1403_v32, %v1356_v30  ;;  %v1590_v30 = vld [vmem:[%s3946_s9 + $0x38] sm:$0xff] }
 0x548   : > { %vm1421_vm7 = vcmp.ge.f32.partialorder %v1404_v33, 0.0 }
 0x549   : > { %vm2817_vm8 = vmpackc.low %vm1421_vm7, %vm1420_vm6 }
 0x54a   : > { %2818 = vmatmul.msk.bf16.gmra.mxu2 %vm2817_vm8, %v3079_v60 }
 0x55d   : > { %v1535_v34 = vpop.f32.mrf.mxu2 }
 0x565   : > { %v1537_v35 = vpop.f32.mrf.mxu2 }
 0x566   : > { %v1575_v2 = vpack.c.bf16 %v1537_v35, %v1535_v34 }
 0x56d   : > { %v1540_v36 = vpop.f32.mrf.mxu2 }
 0x575   : > { %v1542_v37 = vpop.f32.mrf.mxu2 }
 0x576   : > { %v1576_v1 = vpack.c.bf16 %v1542_v37, %v1540_v36  ;;  %v1591_v37 = vld [vmem:[%s3946_s9 + $0x40] sm:$0xff] }
 0x57d   : > { %v1545_v42 = vpop.f32.mrf.mxu2 }
 0x585   : > { %v1547_v43 = vpop.f32.mrf.mxu2 }
 0x586   : > { %v1577_v0 = vpack.c.bf16 %v1547_v43, %v1545_v42  ;;  %v1592_v43 = vld [vmem:[%s3946_s9 + $0x48] sm:$0xff] }
 0x58d   : > { %v1550_v44 = vpop.f32.mrf.mxu2 }
 0x595   : > { %v1552_v46 = vpop.f32.mrf.mxu2 }
 0x596   : > { %v1578_v63 = vpack.c.bf16 %v1552_v46, %v1550_v44 }
 0x59d   : > { %v1555_v48 = vpop.f32.mrf.mxu2 }
 0x5a5   : > { %v1557_v51 = vpop.f32.mrf.mxu2 }
 0x5a6   : > { %v1579_v62 = vpack.c.bf16 %v1557_v51, %v1555_v48 }
 0x5ad   : > { %v1560_v52 = vpop.f32.mrf.mxu2 }
 0x5b5   : > { %v1562_v53 = vpop.f32.mrf.mxu2 }
 0x5b6   : > { %v1580_v61 = vpack.c.bf16 %v1562_v53, %v1560_v52 }
 0x5bd   : > { %v1565_v54 = vpop.f32.mrf.mxu2 }
 0x5c5   : > { %v1567_v55 = vpop.f32.mrf.mxu2 }
 0x5c6   : > { %v1581_v59 = vpack.c.bf16 %v1567_v55, %v1565_v54  ;;  %v1593_v54 = vld [vmem:[%s3946_s9 + $0x50] sm:$0xff] }
 0x5cd   : > { %v1570_v56 = vpop.f32.mrf.mxu2 }
 0x5d5   : > { %v1572_v57 = vpop.f32.mrf.mxu2 }
 0x5d6   : > { %v1582_v58 = vpack.c.bf16 %v1572_v57, %v1570_v56  ;;  %v1594_v56 = vld [vmem:[%s3946_s9 + $0x58] sm:$0xff] }
 0x5d8   : > { %1599 = vmatpush.bf16.msra.mxu3 %v1582_v58 }
 0x5dc   : > { %1600 = vmatpush.bf16.msra.mxu3 %v1581_v59 }
 0x5e0   : > { %1601 = vmatpush.bf16.msra.mxu3 %v1580_v61 }
 0x5e4   : > { %1602 = vmatpush.bf16.msra.mxu3 %v1579_v62 }
 0x5e8   : > { %1603 = vmatpush.bf16.msra.mxu3 %v1578_v63 }
 0x5ec   : > { %1604 = vmatpush.bf16.msra.mxu3 %v1577_v0  ;;  %v1595_v0 = vld [vmem:[%s3946_s9 + $0x60] sm:$0xff] }
 0x5f0   : > { %1605 = vmatpush.bf16.msra.mxu3 %v1576_v1 }
 0x5f4   : > { %1606 = vmatpush.bf16.msra.mxu3 %v1575_v2  ;;  %v1596_v2 = vld [vmem:[%s3946_s9 + $0x68] sm:$0xff] }
 0x5f7   : > { %1607 = vmatmul.bf16.vlgmr.msra.gmra.mxu3 %v3215_v38  ;;  %v3027_v38 = vld [vmem:[%s3947_s10 + $0x10] sm:$0xff] }
 0x5f8   : > { %1766 = vmatpush.bf16.msra.mxu0 %v3027_v38 }
 0x607   : > { %1612 = vmatmul.bf16.gmra.mxu3 %v3221_v39  ;;  %v3026_v39 = vld [vmem:[%s3947_s10 + $0x8] sm:$0xff] }
 0x608   : > { %1767 = vmatpush.bf16.msra.mxu0 %v3026_v39 }
 0x617   : > { %1617 = vmatmul.bf16.gmra.mxu3 %v3227_v40  ;;  %v3025_v40 = vld [vmem:[%s3947_s10] sm:$0xff] }
 0x618   : > { %1768 = vmatpush.bf16.msra.mxu0 %v3025_v40 }
 0x627   : > { %1622 = vmatmul.bf16.gmra.mxu3 %v3248_v45  ;;  %v1583_v45 = vld [vmem:[%s3946_s9] sm:$0xff] }
 0x637   : > { %1627 = vmatmul.bf16.gmra.mxu3 %v3266_v49  ;;  %v1584_v49 = vld [vmem:[%s3946_s9 + $0x8] sm:$0xff] }
 0x647   : > { %1632 = vmatmul.bf16.gmra.mxu3 %v3233_v41 }
 0x657   : > { %1637 = vmatmul.bf16.gmra.mxu3 %v3256_v47 }
 0x667   : > { %1642 = vmatmul.bf16.gmra.mxu3 %v3271_v50 }
 0x67a   : > { %v1608_v41 = vpop.f32.mrf.mxu3 }
 0x67b   : > { %v1609_v47 = vadd.f32 %v1608_v41, %v1583_v45 }
 0x67d   : > { %vm1648_vm9 = vcmp.ge.f32.partialorder %v1609_v47, 0.0  ;;  %v1597_v47 = vld [vmem:[%s3946_s9 + $0x70] sm:$0xff] }
 0x67e   : > { %v2819_v7 = vsel %vm1648_vm9, 1.0, %v3080_v6 }
 0x682   : > { %v1610_v4 = vpop.f32.mrf.mxu3 }
 0x683   : > { %v1611_v5 = vadd.f32 %v1610_v4, %v1584_v49  ;;  %v1598_v4 = vld [vmem:[%s3946_s9 + $0x78] sm:$0xff] }
 0x685   : > { %vm1649_vm10 = vcmp.ge.f32.partialorder %v1611_v5, 0.0 }
 0x686   : > { %v2820_v8 = vsel %vm1649_vm10, 1.0, %v3080_v6 }
 0x687   : > { %v1696_v50 = vpack.c.bf16 %v2820_v8, %v2819_v7 }
 0x689   : > { %2851 = vmatmul.msk.bf16.vlgmr.msra.gmra.mxu0 %vm1736_vm11, %v1696_v50 }
 0x68a   : > { %v1613_v9 = vpop.f32.mrf.mxu3 }
 0x68b   : > { %v1614_v11 = vadd.f32 %v1613_v9, %v1585_v10 }
 0x68d   : > { %vm1650_vm12 = vcmp.ge.f32.partialorder %v1614_v11, 0.0 }
 0x68e   : > { %v2821_v15 = vsel %vm1650_vm12, 1.0, %v3080_v6 }
 0x692   : > { %v1615_v13 = vpop.f32.mrf.mxu3 }
 0x693   : > { %v1616_v14 = vadd.f32 %v1615_v13, %v1586_v12 }
 0x695   : > { %vm1651_vm13 = vcmp.ge.f32.partialorder %v1616_v14, 0.0 }
 0x696   : > { %v2822_v16 = vsel %vm1651_vm13, 1.0, %v3080_v6 }
 0x697   : > { %v1697_v17 = vpack.c.bf16 %v2822_v16, %v2821_v15 }
 0x699   : > { %2852 = vmatmul.msk.bf16.gmra.mxu0 %vm1736_vm11, %v1697_v17 }
 0x69a   : > { %v1618_v18 = vpop.f32.mrf.mxu3 }
 0x69b   : > { %v1619_v20 = vadd.f32 %v1618_v18, %v1587_v19 }
 0x69d   : > { %vm1652_vm14 = vcmp.ge.f32.partialorder %v1619_v20, 0.0 }
 0x69e   : > { %v2823_v24 = vsel %vm1652_vm14, 1.0, %v3080_v6 }
 0x6a2   : > { %v1620_v22 = vpop.f32.mrf.mxu3 }
 0x6a3   : > { %v1621_v23 = vadd.f32 %v1620_v22, %v1588_v21 }
 0x6a5   : > { %vm1653_vm15 = vcmp.ge.f32.partialorder %v1621_v23, 0.0 }
 0x6a6   : > { %v2824_v25 = vsel %vm1653_vm15, 1.0, %v3080_v6 }
 0x6a7   : > { %v1698_v26 = vpack.c.bf16 %v2824_v25, %v2823_v24 }
 0x6a9   : > { %2853 = vmatmul.msk.bf16.gmra.mxu0 %vm1736_vm11, %v1698_v26 }
 0x6aa   : > { %v1623_v27 = vpop.f32.mrf.mxu3 }
 0x6ab   : > { %v1624_v29 = vadd.f32 %v1623_v27, %v1589_v28 }
 0x6ad   : > { %vm1654_vm0 = vcmp.ge.f32.partialorder %v1624_v29, 0.0 }
 0x6ae   : > { %v2825_v33 = vsel %vm1654_vm0, 1.0, %v3080_v6 }
 0x6b2   : > { %v1625_v31 = vpop.f32.mrf.mxu3 }
 0x6b3   : > { %v1626_v32 = vadd.f32 %v1625_v31, %v1590_v30 }
 0x6b5   : > { %vm1655_vm1 = vcmp.ge.f32.partialorder %v1626_v32, 0.0 }
 0x6b6   : > { %v2826_v34 = vsel %vm1655_vm1, 1.0, %v3080_v6 }
 0x6b7   : > { %v1699_v35 = vpack.c.bf16 %v2826_v34, %v2825_v33  ;;  %v3611_v34 = vld [vmem:[%s3966_s26] sm:$0xff] }
 0x6b9   : > { %2854 = vmatmul.msk.bf16.gmra.mxu0 %vm1736_vm11, %v1699_v35  ;;  %v3617_v35 = vld [vmem:[%s3966_s26 + $0x8] sm:$0xff] }
 0x6ba   : > { %v1628_v36 = vpop.f32.mrf.mxu3 }
 0x6bb   : > { %v1629_v42 = vadd.f32 %v1628_v36, %v1591_v37  ;;  %v3623_v36 = vld [vmem:[%s3966_s26 + $0x10] sm:$0xff]  ;;  %v3629_v37 = vld [vmem:[%s3966_s26 + $0x18] sm:$0xff] }
 0x6bd   : > { %vm1656_vm2 = vcmp.ge.f32.partialorder %v1629_v42, 0.0  ;;  %v3635_v42 = vld [vmem:[%s3966_s26 + $0x20] sm:$0xff] }
 0x6be   : > { %v2827_v48 = vsel %vm1656_vm2, 1.0, %v3080_v6 }
 0x6c2   : > { %v1630_v44 = vpop.f32.mrf.mxu3 }
 0x6c3   : > { %v1631_v46 = vadd.f32 %v1630_v44, %v1592_v43  ;;  %v3032_v43 = vld [vmem:[%s3949_s12 + $0x18] sm:$0xff]  ;;  %v3644_v44 = vld [vmem:[%s3966_s26 + $0x28] sm:$0xff] }
 0x6c4   : > { %1999 = vmatpush.bf16.msrb.mxu2 %v3032_v43 }
 0x6c5   : > { %vm1657_vm3 = vcmp.ge.f32.partialorder %v1631_v46, 0.0  ;;  %v3031_v46 = vld [vmem:[%s3949_s12 + $0x10] sm:$0xff] }
 0x6c6   : > { %v2828_v51 = vsel %vm1657_vm3, 1.0, %v3080_v6 }
 0x6c7   : > { %v1700_v52 = vpack.c.bf16 %v2828_v51, %v2827_v48  ;;  %v3653_v48 = vld [vmem:[%s3966_s26 + $0x30] sm:$0xff]  ;;  %v3030_v51 = vld [vmem:[%s3949_s12 + $0x8] sm:$0xff] }
 0x6c8   : > { %2000 = vmatpush.bf16.msrb.mxu2 %v3031_v46 }
 0x6c9   : > { %2855 = vmatmul.msk.bf16.gmra.mxu0 %vm1736_vm11, %v1700_v52  ;;  %v3029_v52 = vld [vmem:[%s3949_s12] sm:$0xff] }
 0x6ca   : > { %v1633_v53 = vpop.f32.mrf.mxu3 }
 0x6cb   : > { %v1634_v55 = vadd.f32 %v1633_v53, %v1593_v54  ;;  %v3665_v53 = vld [vmem:[%s3966_s26 + $0x38] sm:$0xff] }
 0x6cc   : > { %2001 = vmatpush.bf16.msrb.mxu2 %v3030_v51 }
 0x6cd   : > { %vm1658_vm4 = vcmp.ge.f32.partialorder %v1634_v55, 0.0  ;;  %v1818_v55 = vld [vmem:[%s3948_s11] sm:$0xff] }
 0x6ce   : > { %v2829_v59 = vsel %vm1658_vm4, 1.0, %v3080_v6 }
 0x6d0   : > { %2002 = vmatpush.bf16.msrb.mxu2 %v3029_v52 }
 0x6d2   : > { %v1635_v57 = vpop.f32.mrf.mxu3 }
 0x6d3   : > { %v1636_v58 = vadd.f32 %v1635_v57, %v1594_v56  ;;  %v1819_v57 = vld [vmem:[%s3948_s11 + $0x8] sm:$0xff] }
 0x6d5   : > { %vm1659_vm5 = vcmp.ge.f32.partialorder %v1636_v58, 0.0 }
 0x6d6   : > { %v2830_v61 = vsel %vm1659_vm5, 1.0, %v3080_v6 }
 0x6d7   : > { %v1701_v62 = vpack.c.bf16 %v2830_v61, %v2829_v59 }
 0x6d9   : > { %2856 = vmatmul.msk.bf16.gmra.mxu0 %vm1736_vm11, %v1701_v62 }
 0x6da   : > { %v1638_v63 = vpop.f32.mrf.mxu3 }
 0x6db   : > { %v1639_v1 = vadd.f32 %v1638_v63, %v1595_v0 }
 0x6dd   : > { %vm1660_vm6 = vcmp.ge.f32.partialorder %v1639_v1, 0.0  ;;  %v1820_v1 = vld [vmem:[%s3948_s11 + $0x10] sm:$0xff] }
 0x6de   : > { %v2831_v39 = vsel %vm1660_vm6, 1.0, %v3080_v6 }
 0x6e2   : > { %v1640_v3 = vpop.f32.mrf.mxu3 }
 0x6e3   : > { %v1641_v38 = vadd.f32 %v1640_v3, %v1596_v2  ;;  %v1821_v3 = vld [vmem:[%s3948_s11 + $0x18] sm:$0xff] }
 0x6e5   : > { %vm1661_vm7 = vcmp.ge.f32.partialorder %v1641_v38, 0.0 }
 0x6e6   : > { %v2832_v40 = vsel %vm1661_vm7, 1.0, %v3080_v6 }
 0x6e7   : > { %v1702_v41 = vpack.c.bf16 %v2832_v40, %v2831_v39 }
 0x6e9   : > { %2857 = vmatmul.msk.bf16.gmra.mxu0 %vm1736_vm11, %v1702_v41 }
 0x6ea   : > { %v1643_v45 = vpop.f32.mrf.mxu3 }
 0x6eb   : > { %v1644_v49 = vadd.f32 %v1643_v45, %v1597_v47 }
 0x6ed   : > { %vm1662_vm8 = vcmp.ge.f32.partialorder %v1644_v49, 0.0  ;;  %v1822_v49 = vld [vmem:[%s3948_s11 + $0x20] sm:$0xff] }
 0x6ee   : > { %v2833_v8 = vsel %vm1662_vm8, 1.0, %v3080_v6 }
 0x6f2   : > { %v1645_v5 = vpop.f32.mrf.mxu3 }
 0x6f3   : > { %v1646_v7 = vadd.f32 %v1645_v5, %v1598_v4  ;;  %v1823_v5 = vld [vmem:[%s3948_s11 + $0x28] sm:$0xff] }
 0x6f5   : > { %vm1663_vm9 = vcmp.ge.f32.partialorder %v1646_v7, 0.0 }
 0x6f6   : > { %v2834_v50 = vsel %vm1663_vm9, 1.0, %v3080_v6 }
 0x6f7   : > { %v1703_v9 = vpack.c.bf16 %v2834_v50, %v2833_v8 }
 0x6f9   : > { %2858 = vmatmul.msk.bf16.gmra.mxu0 %vm1736_vm11, %v1703_v9 }
 0x706   : > { %v1770_v10 = vpop.f32.mrf.mxu0 }
 0x70e   : > { %v1772_v11 = vpop.f32.mrf.mxu0 }
 0x70f   : > { %v1810_v33 = vpack.c.bf16 %v1772_v11, %v1770_v10 }
 0x716   : > { %v1775_v12 = vpop.f32.mrf.mxu0 }
 0x71e   : > { %v1777_v13 = vpop.f32.mrf.mxu0 }
 0x71f   : > { %v1811_v32 = vpack.c.bf16 %v1777_v13, %v1775_v12  ;;  %v1824_v12 = vld [vmem:[%s3948_s11 + $0x30] sm:$0xff] }
 0x726   : > { %v1780_v14 = vpop.f32.mrf.mxu0 }
 0x72e   : > { %v1782_v15 = vpop.f32.mrf.mxu0 }
 0x72f   : > { %v1812_v31 = vpack.c.bf16 %v1782_v15, %v1780_v14  ;;  %v1825_v14 = vld [vmem:[%s3948_s11 + $0x38] sm:$0xff] }
 0x736   : > { %v1785_v16 = vpop.f32.mrf.mxu0 }
 0x73e   : > { %v1787_v17 = vpop.f32.mrf.mxu0 }
 0x73f   : > { %v1813_v30 = vpack.c.bf16 %v1787_v17, %v1785_v16 }
 0x746   : > { %v1790_v18 = vpop.f32.mrf.mxu0 }
 0x74e   : > { %v1792_v19 = vpop.f32.mrf.mxu0 }
 0x74f   : > { %v1814_v29 = vpack.c.bf16 %v1792_v19, %v1790_v18 }
 0x756   : > { %v1795_v20 = vpop.f32.mrf.mxu0 }
 0x75e   : > { %v1797_v21 = vpop.f32.mrf.mxu0 }
 0x75f   : > { %v1815_v28 = vpack.c.bf16 %v1797_v21, %v1795_v20  ;;  %v1826_v21 = vld [vmem:[%s3948_s11 + $0x40] sm:$0xff] }
 0x766   : > { %v1800_v22 = vpop.f32.mrf.mxu0 }
 0x76e   : > { %v1802_v23 = vpop.f32.mrf.mxu0 }
 0x76f   : > { %v1816_v27 = vpack.c.bf16 %v1802_v23, %v1800_v22  ;;  %v1827_v23 = vld [vmem:[%s3948_s11 + $0x48] sm:$0xff] }
 0x776   : > { %v1805_v24 = vpop.f32.mrf.mxu0 }
 0x77e   : > { %v1807_v25 = vpop.f32.mrf.mxu0 }
 0x77f   : > { %v1817_v26 = vpack.c.bf16 %v1807_v25, %v1805_v24 }
 0x781   : > { %1834 = vmatpush.bf16.msra.mxu1 %v1817_v26 }
 0x785   : > { %1835 = vmatpush.bf16.msra.mxu1 %v1816_v27 }
 0x789   : > { %1836 = vmatpush.bf16.msra.mxu1 %v1815_v28 }
 0x78d   : > { %1837 = vmatpush.bf16.msra.mxu1 %v1814_v29 }
 0x791   : > { %1838 = vmatpush.bf16.msra.mxu1 %v1813_v30  ;;  %v1828_v30 = vld [vmem:[%s3948_s11 + $0x50] sm:$0xff] }
 0x795   : > { %1839 = vmatpush.bf16.msra.mxu1 %v1812_v31 }
 0x799   : > { %1840 = vmatpush.bf16.msra.mxu1 %v1811_v32  ;;  %v1829_v32 = vld [vmem:[%s3948_s11 + $0x58] sm:$0xff] }
 0x79d   : > { %1841 = vmatpush.bf16.msra.mxu1 %v1810_v33 }
 0x7a0   : > { %1842 = vmatmul.bf16.vlgmr.msra.gmra.mxu1 %v3611_v34 }
 0x7b0   : > { %1847 = vmatmul.bf16.gmra.mxu1 %v3617_v35 }
 0x7c0   : > { %1852 = vmatmul.bf16.gmra.mxu1 %v3623_v36 }
 0x7d0   : > { %1857 = vmatmul.bf16.gmra.mxu1 %v3629_v37 }
 0x7e0   : > { %1862 = vmatmul.bf16.gmra.mxu1 %v3635_v42 }
 0x7f0   : > { %1867 = vmatmul.bf16.gmra.mxu1 %v3644_v44 }
 0x800   : > { %1872 = vmatmul.bf16.gmra.mxu1 %v3653_v48 }
 0x810   : > { %1877 = vmatmul.bf16.gmra.mxu1 %v3665_v53 }
 0x81d   : > { %v1843_v54 = vpop.f32.mrf.mxu1 }
 0x81e   : > { %v1844_v56 = vadd.f32 %v1843_v54, %v1818_v55  ;;  %v1830_v55 = vld [vmem:[%s3948_s11 + $0x60] sm:$0xff] }
 0x820   : > { %vm1883_vm10 = vcmp.ge.f32.partialorder %v1844_v56, 0.0 }
 0x821   : > { %v2859_v61 = vsel %vm1883_vm10, 1.0, %v3080_v6 }
 0x825   : > { %v1845_v58 = vpop.f32.mrf.mxu1 }
 0x826   : > { %v1846_v59 = vadd.f32 %v1845_v58, %v1819_v57  ;;  %v1831_v57 = vld [vmem:[%s3948_s11 + $0x68] sm:$0xff] }
 0x828   : > { %vm1884_vm12 = vcmp.ge.f32.partialorder %v1846_v59, 0.0 }
 0x829   : > { %v2860_v62 = vsel %vm1884_vm12, 1.0, %v3080_v6 }
 0x82a   : > { %v1931_v63 = vpack.c.bf16 %v2860_v62, %v2859_v61 }
 0x82c   : > { %2891 = vmatmul.msk.bf16.vlgmr.msrb.gmra.mxu2 %vm1736_vm11, %v1931_v63 }
 0x82d   : > { %v1848_v0 = vpop.f32.mrf.mxu1 }
 0x82e   : > { %v1849_v2 = vadd.f32 %v1848_v0, %v1820_v1  ;;  %v1832_v1 = vld [vmem:[%s3948_s11 + $0x70] sm:$0xff] }
 0x830   : > { %vm1885_vm13 = vcmp.ge.f32.partialorder %v1849_v2, 0.0 }
 0x831   : > { %v2861_v40 = vsel %vm1885_vm13, 1.0, %v3080_v6 }
 0x835   : > { %v1850_v38 = vpop.f32.mrf.mxu1 }
 0x836   : > { %v1851_v39 = vadd.f32 %v1850_v38, %v1821_v3  ;;  %v1833_v3 = vld [vmem:[%s3948_s11 + $0x78] sm:$0xff] }
 0x838   : > { %vm1886_vm14 = vcmp.ge.f32.partialorder %v1851_v39, 0.0 }
 0x839   : > { %v2862_v41 = vsel %vm1886_vm14, 1.0, %v3080_v6 }
 0x83a   : > { %v1932_v45 = vpack.c.bf16 %v2862_v41, %v2861_v40 }
 0x83c   : > { %2892 = vmatmul.msk.bf16.gmra.mxu2 %vm1736_vm11, %v1932_v45 }
 0x83d   : > { %v1853_v47 = vpop.f32.mrf.mxu1 }
 0x83e   : > { %v1854_v4 = vadd.f32 %v1853_v47, %v1822_v49 }
 0x840   : > { %vm1887_vm15 = vcmp.ge.f32.partialorder %v1854_v4, 0.0 }
 0x841   : > { %v2863_v50 = vsel %vm1887_vm15, 1.0, %v3080_v6 }
 0x845   : > { %v1855_v7 = vpop.f32.mrf.mxu1 }
 0x846   : > { %v1856_v8 = vadd.f32 %v1855_v7, %v1823_v5 }
 0x848   : > { %vm1888_vm0 = vcmp.ge.f32.partialorder %v1856_v8, 0.0 }
 0x849   : > { %v2864_v9 = vsel %vm1888_vm0, 1.0, %v3080_v6 }
 0x84a   : > { %v1933_v10 = vpack.c.bf16 %v2864_v9, %v2863_v50 }
 0x84c   : > { %2893 = vmatmul.msk.bf16.gmra.mxu2 %vm1736_vm11, %v1933_v10 }
 0x84d   : > { %v1858_v11 = vpop.f32.mrf.mxu1 }
 0x84e   : > { %v1859_v13 = vadd.f32 %v1858_v11, %v1824_v12 }
 0x850   : > { %vm1889_vm1 = vcmp.ge.f32.partialorder %v1859_v13, 0.0 }
 0x851   : > { %v2865_v17 = vsel %vm1889_vm1, 1.0, %v3080_v6 }
 0x855   : > { %v1860_v15 = vpop.f32.mrf.mxu1 }
 0x856   : > { %v1861_v16 = vadd.f32 %v1860_v15, %v1825_v14 }
 0x858   : > { %vm1890_vm2 = vcmp.ge.f32.partialorder %v1861_v16, 0.0 }
 0x859   : > { %v2866_v18 = vsel %vm1890_vm2, 1.0, %v3080_v6 }
 0x85a   : > { %v1934_v19 = vpack.c.bf16 %v2866_v18, %v2865_v17 }
 0x85c   : > { %2894 = vmatmul.msk.bf16.gmra.mxu2 %vm1736_vm11, %v1934_v19 }
 0x85d   : > { %v1863_v20 = vpop.f32.mrf.mxu1 }
 0x85e   : > { %v1864_v22 = vadd.f32 %v1863_v20, %v1826_v21 }
 0x860   : > { %vm1891_vm3 = vcmp.ge.f32.partialorder %v1864_v22, 0.0 }
 0x861   : > { %v2867_v26 = vsel %vm1891_vm3, 1.0, %v3080_v6 }
 0x865   : > { %v1865_v24 = vpop.f32.mrf.mxu1 }
 0x866   : > { %v1866_v25 = vadd.f32 %v1865_v24, %v1827_v23 }
 0x868   : > { %vm1892_vm4 = vcmp.ge.f32.partialorder %v1866_v25, 0.0 }
 0x869   : > { %v2868_v27 = vsel %vm1892_vm4, 1.0, %v3080_v6 }
 0x86a   : > { %v1935_v28 = vpack.c.bf16 %v2868_v27, %v2867_v26  ;;  %v3036_v26 = vld [vmem:[%s3951_s14 + $0x18] sm:$0xff]  ;;  %v3035_v27 = vld [vmem:[%s3951_s14 + $0x10] sm:$0xff] }
 0x86b   : > { %2233 = vmatpush.bf16.msrb.mxu0 %v3036_v26 }
 0x86c   : > { %2895 = vmatmul.msk.bf16.gmra.mxu2 %vm1736_vm11, %v1935_v28  ;;  %v3034_v28 = vld [vmem:[%s3951_s14 + $0x8] sm:$0xff] }
 0x86d   : > { %v1868_v29 = vpop.f32.mrf.mxu1 }
 0x86e   : > { %v1869_v31 = vadd.f32 %v1868_v29, %v1828_v30  ;;  %v3033_v29 = vld [vmem:[%s3951_s14] sm:$0xff] }
 0x86f   : > { %2234 = vmatpush.bf16.msrb.mxu0 %v3035_v27 }
 0x870   : > { %vm1893_vm5 = vcmp.ge.f32.partialorder %v1869_v31, 0.0  ;;  %v2052_v31 = vld [vmem:[%s3950_s13] sm:$0xff] }
 0x871   : > { %v2869_v46 = vsel %vm1893_vm5, 1.0, %v3080_v6 }
 0x873   : > { %2235 = vmatpush.bf16.msrb.mxu0 %v3034_v28 }
 0x875   : > { %v1870_v33 = vpop.f32.mrf.mxu1 }
 0x876   : > { %v1871_v43 = vadd.f32 %v1870_v33, %v1829_v32  ;;  %v2053_v33 = vld [vmem:[%s3950_s13 + $0x8] sm:$0xff] }
 0x877   : > { %2236 = vmatpush.bf16.msrb.mxu0 %v3033_v29 }
 0x878   : > { %vm1894_vm6 = vcmp.ge.f32.partialorder %v1871_v43, 0.0 }
 0x879   : > { %v2870_v51 = vsel %vm1894_vm6, 1.0, %v3080_v6 }
 0x87a   : > { %v1936_v52 = vpack.c.bf16 %v2870_v51, %v2869_v46 }
 0x87c   : > { %2896 = vmatmul.msk.bf16.gmra.mxu2 %vm1736_vm11, %v1936_v52 }
 0x87d   : > { %v1873_v54 = vpop.f32.mrf.mxu1 }
 0x87e   : > { %v1874_v56 = vadd.f32 %v1873_v54, %v1830_v55 }
 0x880   : > { %vm1895_vm7 = vcmp.ge.f32.partialorder %v1874_v56, 0.0  ;;  %v2054_v56 = vld [vmem:[%s3950_s13 + $0x10] sm:$0xff] }
 0x881   : > { %v2871_v61 = vsel %vm1895_vm7, 1.0, %v3080_v6 }
 0x885   : > { %v1875_v58 = vpop.f32.mrf.mxu1 }
 0x886   : > { %v1876_v59 = vadd.f32 %v1875_v58, %v1831_v57  ;;  %v2055_v58 = vld [vmem:[%s3950_s13 + $0x18] sm:$0xff] }
 0x888   : > { %vm1896_vm8 = vcmp.ge.f32.partialorder %v1876_v59, 0.0 }
 0x889   : > { %v2872_v62 = vsel %vm1896_vm8, 1.0, %v3080_v6 }
 0x88a   : > { %v1937_v63 = vpack.c.bf16 %v2872_v62, %v2871_v61 }
 0x88c   : > { %2897 = vmatmul.msk.bf16.gmra.mxu2 %vm1736_vm11, %v1937_v63 }
 0x88d   : > { %v1878_v0 = vpop.f32.mrf.mxu1 }
 0x88e   : > { %v1879_v2 = vadd.f32 %v1878_v0, %v1832_v1 }
 0x890   : > { %vm1897_vm9 = vcmp.ge.f32.partialorder %v1879_v2, 0.0  ;;  %v2056_v2 = vld [vmem:[%s3950_s13 + $0x20] sm:$0xff] }
 0x891   : > { %v2873_v40 = vsel %vm1897_vm9, 1.0, %v3080_v6 }
 0x895   : > { %v1880_v38 = vpop.f32.mrf.mxu1 }
 0x896   : > { %v1881_v39 = vadd.f32 %v1880_v38, %v1833_v3  ;;  %v2057_v38 = vld [vmem:[%s3950_s13 + $0x28] sm:$0xff] }
 0x898   : > { %vm1898_vm10 = vcmp.ge.f32.partialorder %v1881_v39, 0.0 }
 0x899   : > { %v2874_v41 = vsel %vm1898_vm10, 1.0, %v3080_v6 }
 0x89a   : > { %v1938_v45 = vpack.c.bf16 %v2874_v41, %v2873_v40 }
 0x89c   : > { %2898 = vmatmul.msk.bf16.gmra.mxu2 %vm1736_vm11, %v1938_v45 }
 0x8af   : > { %v2004_v47 = vpop.f32.mrf.mxu2 }
 0x8b7   : > { %v2006_v49 = vpop.f32.mrf.mxu2 }
 0x8b8   : > { %v2044_v4 = vpack.c.bf16 %v2006_v49, %v2004_v47 }
 0x8bf   : > { %v2009_v5 = vpop.f32.mrf.mxu2 }
 0x8c7   : > { %v2011_v7 = vpop.f32.mrf.mxu2 }
 0x8c8   : > { %v2045_v8 = vpack.c.bf16 %v2011_v7, %v2009_v5  ;;  %v2059_v7 = vld [vmem:[%s3950_s13 + $0x38] sm:$0xff] }
 0x8cf   : > { %v2014_v50 = vpop.f32.mrf.mxu2 }
 0x8d7   : > { %v2016_v9 = vpop.f32.mrf.mxu2 }
 0x8d8   : > { %v2046_v10 = vpack.c.bf16 %v2016_v9, %v2014_v50 }
 0x8df   : > { %v2019_v11 = vpop.f32.mrf.mxu2 }
 0x8e7   : > { %v2021_v12 = vpop.f32.mrf.mxu2 }
 0x8e8   : > { %v2047_v13 = vpack.c.bf16 %v2021_v12, %v2019_v11 }
 0x8ef   : > { %v2024_v14 = vpop.f32.mrf.mxu2 }
 0x8f7   : > { %v2026_v15 = vpop.f32.mrf.mxu2 }
 0x8f8   : > { %v2048_v25 = vpack.c.bf16 %v2026_v15, %v2024_v14  ;;  %v2061_v15 = vld [vmem:[%s3950_s13 + $0x48] sm:$0xff] }
 0x8ff   : > { %v2029_v16 = vpop.f32.mrf.mxu2 }
 0x907   : > { %v2031_v17 = vpop.f32.mrf.mxu2 }
 0x908   : > { %v2049_v24 = vpack.c.bf16 %v2031_v17, %v2029_v16 }
 0x90f   : > { %v2034_v18 = vpop.f32.mrf.mxu2 }
 0x917   : > { %v2036_v19 = vpop.f32.mrf.mxu2 }
 0x918   : > { %v2050_v23 = vpack.c.bf16 %v2036_v19, %v2034_v18 }
 0x91f   : > { %v2039_v20 = vpop.f32.mrf.mxu2 }
 0x927   : > { %v2041_v21 = vpop.f32.mrf.mxu2 }
 0x928   : > { %v2051_v22 = vpack.c.bf16 %v2041_v21, %v2039_v20 }
 0x92a   : > { %2068 = vmatpush.bf16.msrb.mxu3 %v2051_v22  ;;  %v2062_v22 = vld [vmem:[%s3950_s13 + $0x50] sm:$0xff] }
 0x92e   : > { %2069 = vmatpush.bf16.msrb.mxu3 %v2050_v23 }
 0x932   : > { %2070 = vmatpush.bf16.msrb.mxu3 %v2049_v24  ;;  %v2063_v24 = vld [vmem:[%s3950_s13 + $0x58] sm:$0xff] }
 0x936   : > { %2071 = vmatpush.bf16.msrb.mxu3 %v2048_v25 }
 0x93a   : > { %2072 = vmatpush.bf16.msrb.mxu3 %v2047_v13  ;;  %v2060_v13 = vld [vmem:[%s3950_s13 + $0x40] sm:$0xff] }
 0x93e   : > { %2073 = vmatpush.bf16.msrb.mxu3 %v2046_v10 }
 0x942   : > { %2074 = vmatpush.bf16.msrb.mxu3 %v2045_v8 }
 0x946   : > { %2075 = vmatpush.bf16.msrb.mxu3 %v2044_v4  ;;  %v2058_v4 = vld [vmem:[%s3950_s13 + $0x30] sm:$0xff] }
 0x949   : > { %2076 = vmatmul.bf16.vlgmr.msrb.gmra.mxu3 %v3611_v34 }
 0x959   : > { %2081 = vmatmul.bf16.gmra.mxu3 %v3617_v35 }
 0x969   : > { %2086 = vmatmul.bf16.gmra.mxu3 %v3623_v36 }
 0x979   : > { %2091 = vmatmul.bf16.gmra.mxu3 %v3629_v37 }
 0x989   : > { %2096 = vmatmul.bf16.gmra.mxu3 %v3635_v42 }
 0x999   : > { %2101 = vmatmul.bf16.gmra.mxu3 %v3644_v44 }
 0x9a9   : > { %2106 = vmatmul.bf16.gmra.mxu3 %v3653_v48 }
 0x9b9   : > { %2111 = vmatmul.bf16.gmra.mxu3 %v3665_v53 }
 0x9cc   : > { %v2077_v30 = vpop.f32.mrf.mxu3 }
 0x9cd   : > { %v2078_v32 = vadd.f32 %v2077_v30, %v2052_v31  ;;  %v2064_v31 = vld [vmem:[%s3950_s13 + $0x60] sm:$0xff] }
 0x9cf   : > { %vm2117_vm12 = vcmp.ge.f32.partialorder %v2078_v32, 0.0 }
 0x9d0   : > { %v2899_v51 = vsel %vm2117_vm12, 1.0, %v3080_v6 }
 0x9d4   : > { %v2079_v43 = vpop.f32.mrf.mxu3 }
 0x9d5   : > { %v2080_v46 = vadd.f32 %v2079_v43, %v2053_v33  ;;  %v2065_v33 = vld [vmem:[%s3950_s13 + $0x68] sm:$0xff] }
 0x9d7   : > { %vm2118_vm13 = vcmp.ge.f32.partialorder %v2080_v46, 0.0 }
 0x9d8   : > { %v2900_v52 = vsel %vm2118_vm13, 1.0, %v3080_v6 }
 0x9d9   : > { %v2165_v54 = vpack.c.bf16 %v2900_v52, %v2899_v51 }
 0x9db   : > { %2931 = vmatmul.msk.bf16.vlgmr.msrb.gmra.mxu0 %vm1736_vm11, %v2165_v54 }
 0x9dc   : > { %v2082_v55 = vpop.f32.mrf.mxu3 }
 0x9dd   : > { %v2083_v57 = vadd.f32 %v2082_v55, %v2054_v56  ;;  %v2066_v56 = vld [vmem:[%s3950_s13 + $0x70] sm:$0xff] }
 0x9df   : > { %vm2119_vm14 = vcmp.ge.f32.partialorder %v2083_v57, 0.0 }
 0x9e0   : > { %v2901_v62 = vsel %vm2119_vm14, 1.0, %v3080_v6 }
 0x9e4   : > { %v2084_v59 = vpop.f32.mrf.mxu3 }
 0x9e5   : > { %v2085_v61 = vadd.f32 %v2084_v59, %v2055_v58  ;;  %v2067_v58 = vld [vmem:[%s3950_s13 + $0x78] sm:$0xff] }
 0x9e7   : > { %vm2120_vm15 = vcmp.ge.f32.partialorder %v2085_v61, 0.0 }
 0x9e8   : > { %v2902_v63 = vsel %vm2120_vm15, 1.0, %v3080_v6 }
 0x9e9   : > { %v2166_v0 = vpack.c.bf16 %v2902_v63, %v2901_v62 }
 0x9eb   : > { %2932 = vmatmul.msk.bf16.gmra.mxu0 %vm1736_vm11, %v2166_v0 }
 0x9ec   : > { %v2087_v1 = vpop.f32.mrf.mxu3 }
 0x9ed   : > { %v2088_v3 = vadd.f32 %v2087_v1, %v2056_v2 }
 0x9ef   : > { %vm2121_vm0 = vcmp.ge.f32.partialorder %v2088_v3, 0.0 }
 0x9f0   : > { %v2903_v41 = vsel %vm2121_vm0, 1.0, %v3080_v6 }
 0x9f4   : > { %v2089_v39 = vpop.f32.mrf.mxu3 }
 0x9f5   : > { %v2090_v40 = vadd.f32 %v2089_v39, %v2057_v38 }
 0x9f7   : > { %vm2122_vm1 = vcmp.ge.f32.partialorder %v2090_v40, 0.0 }
 0x9f8   : > { %v2904_v45 = vsel %vm2122_vm1, 1.0, %v3080_v6 }
 0x9f9   : > { %v2167_v47 = vpack.c.bf16 %v2904_v45, %v2903_v41 }
 0x9fb   : > { %2933 = vmatmul.msk.bf16.gmra.mxu0 %vm1736_vm11, %v2167_v47 }
 0x9fc   : > { %v2092_v49 = vpop.f32.mrf.mxu3 }
 0x9fd   : > { %v2093_v5 = vadd.f32 %v2092_v49, %v2058_v4 }
 0x9ff   : > { %vm2123_vm2 = vcmp.ge.f32.partialorder %v2093_v5, 0.0 }
 0xa00   : > { %v2905_v9 = vsel %vm2123_vm2, 1.0, %v3080_v6 }
 0xa04   : > { %v2094_v8 = vpop.f32.mrf.mxu3 }
 0xa05   : > { %v2095_v50 = vadd.f32 %v2094_v8, %v2059_v7 }
 0xa07   : > { %vm2124_vm3 = vcmp.ge.f32.partialorder %v2095_v50, 0.0 }
 0xa08   : > { %v2906_v10 = vsel %vm2124_vm3, 1.0, %v3080_v6 }
 0xa09   : > { %v2168_v11 = vpack.c.bf16 %v2906_v10, %v2905_v9 }
 0xa0b   : > { %2934 = vmatmul.msk.bf16.gmra.mxu0 %vm1736_vm11, %v2168_v11 }
 0xa0c   : > { %v2097_v12 = vpop.f32.mrf.mxu3 }
 0xa0d   : > { %v2098_v14 = vadd.f32 %v2097_v12, %v2060_v13 }
 0xa0f   : > { %vm2125_vm4 = vcmp.ge.f32.partialorder %v2098_v14, 0.0 }
 0xa10   : > { %v2907_v18 = vsel %vm2125_vm4, 1.0, %v3080_v6 }
 0xa14   : > { %v2099_v16 = vpop.f32.mrf.mxu3 }
 0xa15   : > { %v2100_v17 = vadd.f32 %v2099_v16, %v2061_v15 }
 0xa17   : > { %vm2126_vm5 = vcmp.ge.f32.partialorder %v2100_v17, 0.0 }
 0xa18   : > { %v2908_v19 = vsel %vm2126_vm5, 1.0, %v3080_v6 }
 0xa19   : > { %v2169_v20 = vpack.c.bf16 %v2908_v19, %v2907_v18  ;;  %v2286_v18 = vld [vmem:[%s3952_s15] sm:$0xff] }
 0xa1b   : > { %2935 = vmatmul.msk.bf16.gmra.mxu0 %vm1736_vm11, %v2169_v20 }
 0xa1c   : > { %v2102_v21 = vpop.f32.mrf.mxu3 }
 0xa1d   : > { %v2103_v23 = vadd.f32 %v2102_v21, %v2062_v22 }
 0xa1f   : > { %vm2127_vm6 = vcmp.ge.f32.partialorder %v2103_v23, 0.0 }
 0xa20   : > { %v2909_v27 = vsel %vm2127_vm6, 1.0, %v3080_v6 }
 0xa24   : > { %v2104_v25 = vpop.f32.mrf.mxu3 }
 0xa25   : > { %v2105_v26 = vadd.f32 %v2104_v25, %v2063_v24  ;;  %v2290_v24 = vld [vmem:[%s3952_s15 + $0x20] sm:$0xff]  ;;  %v2291_v25 = vld [vmem:[%s3952_s15 + $0x28] sm:$0xff] }
 0xa27   : > { %vm2128_vm7 = vcmp.ge.f32.partialorder %v2105_v26, 0.0 }
 0xa28   : > { %v2910_v28 = vsel %vm2128_vm7, 1.0, %v3080_v6 }
 0xa29   : > { %v2170_v29 = vpack.c.bf16 %v2910_v28, %v2909_v27 }
 0xa2b   : > { %2936 = vmatmul.msk.bf16.gmra.mxu0 %vm1736_vm11, %v2170_v29 }
 0xa2c   : > { %v2107_v30 = vpop.f32.mrf.mxu3 }
 0xa2d   : > { %v2108_v32 = vadd.f32 %v2107_v30, %v2064_v31  ;;  %v2292_v31 = vld [vmem:[%s3952_s15 + $0x30] sm:$0xff] }
 0xa2f   : > { %vm2129_vm8 = vcmp.ge.f32.partialorder %v2108_v32, 0.0  ;;  %v2293_v32 = vld [vmem:[%s3952_s15 + $0x38] sm:$0xff] }
 0xa30   : > { %v2911_v51 = vsel %vm2129_vm8, 1.0, %v3080_v6 }
 0xa34   : > { %v2109_v43 = vpop.f32.mrf.mxu3 }
 0xa35   : > { %v2110_v46 = vadd.f32 %v2109_v43, %v2065_v33 }
 0xa37   : > { %vm2130_vm9 = vcmp.ge.f32.partialorder %v2110_v46, 0.0 }
 0xa38   : > { %v2912_v52 = vsel %vm2130_vm9, 1.0, %v3080_v6 }
 0xa39   : > { %v2171_v54 = vpack.c.bf16 %v2912_v52, %v2911_v51 }
 0xa3b   : > { %2937 = vmatmul.msk.bf16.gmra.mxu0 %vm1736_vm11, %v2171_v54 }
 0xa3c   : > { %v2112_v55 = vpop.f32.mrf.mxu3 }
 0xa3d   : > { %v2113_v57 = vadd.f32 %v2112_v55, %v2066_v56 }
 0xa3f   : > { %vm2131_vm10 = vcmp.ge.f32.partialorder %v2113_v57, 0.0 }
 0xa40   : > { %v2913_v62 = vsel %vm2131_vm10, 1.0, %v3080_v6 }
 0xa44   : > { %v2114_v59 = vpop.f32.mrf.mxu3 }
 0xa45   : > { %v2115_v61 = vadd.f32 %v2114_v59, %v2067_v58 }
 0xa47   : > { %vm2132_vm12 = vcmp.ge.f32.partialorder %v2115_v61, 0.0  ;;  %v2300_v61 = vld [vmem:[%s3952_s15 + $0x70] sm:$0xff] }
 0xa48   : > { %v2914_v63 = vsel %vm2132_vm12, 1.0, %v3080_v6 }
 0xa49   : > { %v2172_v0 = vpack.c.bf16 %v2914_v63, %v2913_v62  ;;  %v2299_v62 = vld [vmem:[%s3952_s15 + $0x68] sm:$0xff]  ;;  %v2301_v63 = vld [vmem:[%s3952_s15 + $0x78] sm:$0xff] }
 0xa4b   : > { %2938 = vmatmul.msk.bf16.gmra.mxu0 %vm1736_vm11, %v2172_v0 }
 0xa58   : > { %v2238_v1 = vpop.f32.mrf.mxu0 }
 0xa60   : > { %v2240_v2 = vpop.f32.mrf.mxu0 }
 0xa61   : > { %v2278_v3 = vpack.c.bf16 %v2240_v2, %v2238_v1  ;;  %v2298_v1 = vld [vmem:[%s3952_s15 + $0x60] sm:$0xff] }
 0xa68   : > { %v2243_v38 = vpop.f32.mrf.mxu0 }
 0xa70   : > { %v2245_v39 = vpop.f32.mrf.mxu0 }
 0xa71   : > { %v2279_v40 = vpack.c.bf16 %v2245_v39, %v2243_v38  ;;  %v2297_v39 = vld [vmem:[%s3952_s15 + $0x58] sm:$0xff] }
 0xa78   : > { %v2248_v41 = vpop.f32.mrf.mxu0 }
 0xa80   : > { %v2250_v45 = vpop.f32.mrf.mxu0 }
 0xa81   : > { %v2280_v47 = vpack.c.bf16 %v2250_v45, %v2248_v41  ;;  %v2296_v41 = vld [vmem:[%s3952_s15 + $0x50] sm:$0xff]  ;;  %v2429_v45 = vld [vmem:[%s3954_s17] sm:$0xff] }
 0xa82   : > { %2456 = vmatpush.msra.mxu3 %v2429_v45 }
 0xa88   : > { %v2253_v49 = vpop.f32.mrf.mxu0 }
 0xa90   : > { %v2255_v4 = vpop.f32.mrf.mxu0 }
 0xa91   : > { %v2281_v5 = vpack.c.bf16 %v2255_v4, %v2253_v49  ;;  %v2295_v49 = vld [vmem:[%s3952_s15 + $0x48] sm:$0xff] }
 0xa98   : > { %v2258_v7 = vpop.f32.mrf.mxu0 }
 0xaa0   : > { %v2260_v8 = vpop.f32.mrf.mxu0 }
 0xaa1   : > { %v2282_v16 = vpack.c.bf16 %v2260_v8, %v2258_v7 }
 0xaa8   : > { %v2263_v50 = vpop.f32.mrf.mxu0 }
 0xab0   : > { %v2265_v9 = vpop.f32.mrf.mxu0 }
 0xab1   : > { %v2283_v15 = vpack.c.bf16 %v2265_v9, %v2263_v50  ;;  %v3037_v50 = vld [vmem:[%s3953_s16] sm:$0xff] }
 0xab8   : > { %v2268_v6 = vpop.f32.mrf.mxu0 }
 0xac0   : > { %v2270_v10 = vpop.f32.mrf.mxu0 }
 0xac1   : > { %v2284_v14 = vpack.c.bf16 %v2270_v10, %v2268_v6  ;;  %v3062_v10 = vld [vmem:[%s3955_s18] ss:$0 sm:$0xff] }
 0xac8   : > { %v2273_v11 = vpop.f32.mrf.mxu0 }
 0xad0   : > { %v2275_v12 = vpop.f32.mrf.mxu0 }
 0xad1   : > { %v2285_v13 = vpack.c.bf16 %v2275_v12, %v2273_v11 }
 0xad3   : > { %2302 = vmatpush.bf16.msrb.mxu1 %v2285_v13 }
 0xad7   : > { %2303 = vmatpush.bf16.msrb.mxu1 %v2284_v14 }
 0xadb   : > { %2304 = vmatpush.bf16.msrb.mxu1 %v2283_v15 }
 0xadf   : > { %2305 = vmatpush.bf16.msrb.mxu1 %v2282_v16 }
 0xae3   : > { %2306 = vmatpush.bf16.msrb.mxu1 %v2281_v5  ;;  %v2294_v5 = vld [vmem:[%s3952_s15 + $0x40] sm:$0xff] }
 0xae7   : > { %2307 = vmatpush.bf16.msrb.mxu1 %v2280_v47 }
 0xaeb   : > { %2308 = vmatpush.bf16.msrb.mxu1 %v2279_v40 }
 0xaef   : > { %2309 = vmatpush.bf16.msrb.mxu1 %v2278_v3 }
 0xaf2   : > { %2310 = vmatmul.bf16.vlgmr.msrb.gmra.mxu1 %v3611_v34  ;;  %v2287_v34 = vld [vmem:[%s3952_s15 + $0x8] sm:$0xff] }
 0xb02   : > { %2315 = vmatmul.bf16.gmra.mxu1 %v3617_v35 }
 0xb12   : > { %2320 = vmatmul.bf16.gmra.mxu1 %v3623_v36 }
 0xb22   : > { %2325 = vmatmul.bf16.gmra.mxu1 %v3629_v37 }
 0xb32   : > { %2330 = vmatmul.bf16.gmra.mxu1 %v3635_v42 }
 0xb42   : > { %2335 = vmatmul.bf16.gmra.mxu1 %v3644_v44 }
 0xb52   : > { %2340 = vmatmul.bf16.gmra.mxu1 %v3653_v48  ;;  %v2288_v48 = vld [vmem:[%s3952_s15 + $0x10] sm:$0xff] }
 0xb62   : > { %2345 = vmatmul.bf16.gmra.mxu1 %v3665_v53  ;;  %v2289_v53 = vld [vmem:[%s3952_s15 + $0x18] sm:$0xff] }
 0xb6f   : > { %v2311_v17 = vpop.f32.mrf.mxu1 }
 0xb70   : > { %v2312_v35 = vadd.f32 %v2311_v17, %v2286_v18 }
 0xb72   : > { %vm2351_vm11 = vcmp.ge.f32.partialorder %v2312_v35, 0.0 }
 0xb77   : > { %v2313_v36 = vpop.f32.mrf.mxu1 }
 0xb78   : > { %v2314_v37 = vadd.f32 %v2313_v36, %v2287_v34 }
 0xb7a   : > { %vm2352_vm13 = vcmp.ge.f32.partialorder %v2314_v37, 0.0 }
 0xb7b   : > { %vm3846_vm14 = vmpackc.low %vm2352_vm13, %vm2351_vm11 }
 0xb7f   : > { %v2316_v44 = vpop.f32.mrf.mxu1 }
 0xb80   : > { %v2317_v19 = vadd.f32 %v2316_v44, %v2288_v48 }
 0xb82   : > { %vm2353_vm15 = vcmp.ge.f32.partialorder %v2317_v19, 0.0 }
 0xb87   : > { %v2318_v20 = vpop.f32.mrf.mxu1 }
 0xb88   : > { %v2319_v21 = vadd.f32 %v2318_v20, %v2289_v53 }
 0xb8a   : > { %vm2354_vm0 = vcmp.ge.f32.partialorder %v2319_v21, 0.0 }
 0xb8b   : > { %vm3856_vm1 = vmpackc.low %vm2354_vm0, %vm2353_vm15 }
 0xb8f   : > { %v2321_v23 = vpop.f32.mrf.mxu1 }
 0xb90   : > { %v2322_v26 = vadd.f32 %v2321_v23, %v2290_v24 }
 0xb92   : > { %vm2355_vm2 = vcmp.ge.f32.partialorder %v2322_v26, 0.0 }
 0xb97   : > { %v2323_v27 = vpop.f32.mrf.mxu1 }
 0xb98   : > { %v2324_v28 = vadd.f32 %v2323_v27, %v2291_v25 }
 0xb9a   : > { %vm2356_vm3 = vcmp.ge.f32.partialorder %v2324_v28, 0.0 }
 0xb9b   : > { %vm3866_vm4 = vmpackc.low %vm2356_vm3, %vm2355_vm2 }
 0xb9f   : > { %v2326_v30 = vpop.f32.mrf.mxu1 }
 0xba0   : > { %v2327_v33 = vadd.f32 %v2326_v30, %v2292_v31 }
 0xba2   : > { %vm2357_vm5 = vcmp.ge.f32.partialorder %v2327_v33, 0.0 }
 0xba7   : > { %v2328_v43 = vpop.f32.mrf.mxu1 }
 0xba8   : > { %v2329_v46 = vadd.f32 %v2328_v43, %v2293_v32 }
 0xbaa   : > { %vm2358_vm6 = vcmp.ge.f32.partialorder %v2329_v46, 0.0 }
 0xbab   : > { %vm3876_vm7 = vmpackc.low %vm2358_vm6, %vm2357_vm5 }
 0xbaf   : > { %v2331_v52 = vpop.f32.mrf.mxu1 }
 0xbb0   : > { %v2332_v8 = vadd.f32 %v2331_v52, %v2294_v5 }
 0xbb2   : > { %vm2359_vm5 = vcmp.ge.f32.partialorder %v2332_v8, 0.0 }
 0xbb7   : > { %v2333_v54 = vpop.f32.mrf.mxu1 }
 0xbb8   : > { %v2334_v7 = vadd.f32 %v2333_v54, %v2295_v49 }
 0xbba   : > { %vm2360_vm3 = vcmp.ge.f32.partialorder %v2334_v7, 0.0 }
 0xbbb   : > { %vm2965_vm6 = vmpackc.low %vm2360_vm3, %vm2359_vm5 }
 0xbbf   : > { %v2336_v55 = vpop.f32.mrf.mxu1 }
 0xbc0   : > { %v2337_v4 = vadd.f32 %v2336_v55, %v2296_v41 }
 0xbc2   : > { %vm2361_vm0 = vcmp.ge.f32.partialorder %v2337_v4, 0.0 }
 0xbc7   : > { %v2338_v56 = vpop.f32.mrf.mxu1 }
 0xbc8   : > { %v2339_v47 = vadd.f32 %v2338_v56, %v2297_v39 }
 0xbca   : > { %vm2362_vm15 = vcmp.ge.f32.partialorder %v2339_v47, 0.0 }
 0xbcb   : > { %vm2963_vm2 = vmpackc.low %vm2362_vm15, %vm2361_vm0 }
 0xbcf   : > { %v2341_v57 = vpop.f32.mrf.mxu1 }
 0xbd0   : > { %v2342_v40 = vadd.f32 %v2341_v57, %v2298_v1 }
 0xbd2   : > { %vm2363_vm11 = vcmp.ge.f32.partialorder %v2342_v40, 0.0 }
 0xbd7   : > { %v2343_v58 = vpop.f32.mrf.mxu1 }
 0xbd8   : > { %v2344_v3 = vadd.f32 %v2343_v58, %v2299_v62 }
 0xbda   : > { %vm2364_vm12 = vcmp.ge.f32.partialorder %v2344_v3, 0.0 }
 0xbdb   : > { %vm2961_vm13 = vmpackc.low %vm2364_vm12, %vm2363_vm11 }
 0xbdf   : > { %v2346_v59 = vpop.f32.mrf.mxu1 }
 0xbe0   : > { %v2347_v0 = vadd.f32 %v2346_v59, %v2300_v61 }
 0xbe2   : > { %vm2365_vm8 = vcmp.ge.f32.partialorder %v2347_v0, 0.0 }
 0xbe7   : > { %v2348_v2 = vpop.f32.mrf.mxu1 }
 0xbe8   : > { %v2349_v38 = vadd.f32 %v2348_v2, %v2301_v63 }
 0xbea   : > { %vm2366_vm9 = vcmp.ge.f32.partialorder %v2349_v38, 0.0 }
 0xbeb   : > { %vm2959_vm10 = vmpackc.low %vm2366_vm9, %vm2365_vm8  ;;  %vm2434_vm8 = vcmask 64512  }
 0xbec   : > { %2960 = vmatpush.bf16.msk.msra.mxu2 %vm2959_vm10, %v3079_v60 }
 0xbf0   : > { %2962 = vmatpush.bf16.msk.msra.mxu2 %vm2961_vm13, %v3079_v60 }
 0xbf4   : > { %2964 = vmatpush.bf16.msk.msra.mxu2 %vm2963_vm2, %v3079_v60 }
 0xbf8   : > { %2966 = vmatpush.bf16.msk.msra.mxu2 %vm2965_vm6, %v3079_v60 }
 0xbfc   : > { %2968 = vmatpush.bf16.msk.msra.mxu2 %vm3876_vm7, %v3079_v60 }
 0xc00   : > { %2970 = vmatpush.bf16.msk.msra.mxu2 %vm3866_vm4, %v3079_v60 }
 0xc04   : > { %2972 = vmatpush.bf16.msk.msra.mxu2 %vm3856_vm1, %v3079_v60 }
 0xc08   : > { %2974 = vmatpush.bf16.msk.msra.mxu2 %vm3846_vm14, %v3079_v60 }
 0xc0b   : > { %2423 = vmatmul.bf16.vlgmr.msra.gmra.mxu2 %v3037_v50 }
 0xc8e   : > { %v2424_v9 = vpop.f32.mrf.mxu2 }
 0xc8f   : > { %2975 = vmatmul.msk.f32.vlgmr.msra.gmra.mxu3 %vm2434_vm8, %v2424_v9 }
 0xc96   : > { %v2426_v6 = vpop.f32.mrf.mxu2 }
 0xc97   : > { %2976 = vmatmul.msk.f32.gmra.mxu3 %vm2434_vm8, %v2426_v6 }
 0xd12   : > { %v2458_v60 = vpop.f32.mrf.mxu3 }
 0xd13   : > { %v2459_v11 = vadd.f32 %v3062_v10, %v2458_v60 }
 0xd15   : > { %2464 = vst [vmem:[%s604_s21] sm:$0xff] %v2459_v11 }
 0xd1a   : > { %v2461_v12 = vpop.f32.mrf.mxu3 }
 0xd1b   : > { %v2462_v13 = vadd.f32 %v3062_v10, %v2461_v12 }
 0xd1d   : > { %2465 = vst [vmem:[%s604_s21 + $0x8] sm:$0xff] %v2462_v13 }
 0xd1e PF: > { %s29_s0 = sadd.s32 1, %s3077_s0  }
 0xd1f   : > { %p26_p5 = scmp.ge.s32.totalorder %s29_s0, 4  }
 0xd21   :  { %28 = sbr.rel (!%p26_p5) target bundleno = 5 (0x5), region = 126 }

</bundles_post_ra>
